<compile_context>
chip_gen: v6e
topology: v6e:2x2x1
jax: 0.10.0
libtpu: 0.0.40
codegen_flags: <defaults>
</compile_context>

<pallas_src>
import math

import jax
import jax.numpy as jnp
from jax.experimental import pallas as pl
from jax.experimental.pallas import tpu as pltpu

# ----------------------------- small BERT config -----------------------------
B = 2           # batch
S = 8           # sequence length
H = 32          # hidden size
NH = 4          # attention heads
DH = H // NH    # head dim
F = 64          # FFN intermediate size
NLAYERS = 2
VOCAB = 128
MAX_POS = 16
EPS = 1e-12     # BERT LayerNorm eps

ROWS = B * S          # flattened (batch, seq) rows          = 16
KCOLS = B * NH * S    # flattened (batch, head, key) columns = 64
LANES = 128           # packed-buffer lane width

# ------------------------- packed constant-buffer layout ----------------------
# All row offsets are multiples of 8 (sublane-tile aligned); every section
# starts at lane 0.
R_REP = 0                       # (KCOLS, ROWS)  = (64, 16)
R_HMASK = R_REP + KCOLS         # (KCOLS, H)     = (64, 32)
R_BLK = R_HMASK + KCOLS         # (KCOLS, KCOLS) = (64, 64)
R_CLS_SEL = R_BLK + KCOLS       # (B, ROWS)      = (2, 16)   (padded to 8 rows)
R_EMB_LN = R_CLS_SEL + 8        # row 0 = emb_ln_g, row 1 = emb_ln_b
R_CLS_HEAD = R_EMB_LN + 8       # row 0 = cls_w (as a row of H), row 1 = cls_b
R_LAYER0 = R_CLS_HEAD + 8
# per-layer sub-offsets
L_WQKV = 0                      # (H, 3H) = (32, 96)
L_WO = L_WQKV + H               # (H, H)  = (32, 32)
L_W1 = L_WO + H                 # (H, F)  = (32, 64)
L_W2 = L_W1 + H                 # (F, H)  = (64, 32)
L_VEC = L_W2 + F                # 8 rows: bqkv, bo, b1, b2, ln1g, ln1b, ln2g, ln2b
LAYER_ROWS = L_VEC + 8          # = 168
CONST_ROWS = R_LAYER0 + NLAYERS * LAYER_ROWS   # = 552

DYN_ROWS = 2 * ROWS             # rows 0:ROWS = embeddings, rows ROWS:2*ROWS = bias


def _layernorm(x, g, b):
    mu = jnp.mean(x, axis=-1, keepdims=True)
    var = jnp.mean((x - mu) ** 2, axis=-1, keepdims=True)
    return (x - mu) * jax.lax.rsqrt(var + EPS) * g + b


# --------------------------------- kernel ------------------------------------
def bert_fused_kernel(dyn_ref, const_ref, out_ref):
    f32 = jnp.float32

    # dynamic slab: embeddings + additive attention bias
    x = dyn_ref[0:ROWS, 0:H]                           # (ROWS, H)
    bias = dyn_ref[ROWS:2 * ROWS, 0:KCOLS]             # (ROWS, KCOLS)

    # host-precomputed selector constants
    rep = const_ref[R_REP:R_REP + KCOLS, 0:ROWS]       # (KCOLS, ROWS)
    head_mask = const_ref[R_HMASK:R_HMASK + KCOLS, 0:H]
    blk_sum = const_ref[R_BLK:R_BLK + KCOLS, 0:KCOLS]
    cls_sel = const_ref[R_CLS_SEL:R_CLS_SEL + B, 0:ROWS]

    eg = const_ref[R_EMB_LN:R_EMB_LN + 1, 0:H]
    eb = const_ref[R_EMB_LN + 1:R_EMB_LN + 2, 0:H]
    clsw = const_ref[R_CLS_HEAD:R_CLS_HEAD + 1, 0:H]          # (1, H)
    clsb = const_ref[R_CLS_HEAD + 1:R_CLS_HEAD + 2, 0:1]      # (1, 1)

    # ----- embeddings LayerNorm -----
    x = _layernorm(x, eg, eb)                                 # (ROWS, H)

    # ----- encoder layers (statically unrolled) -----
    for l in range(NLAYERS):
        base = R_LAYER0 + l * LAYER_ROWS
        wqkv = const_ref[base + L_WQKV:base + L_WQKV + H, 0:3 * H]   # (H, 3H)
        wo = const_ref[base + L_WO:base + L_WO + H, 0:H]
        w1 = const_ref[base + L_W1:base + L_W1 + H, 0:F]
        w2 = const_ref[base + L_W2:base + L_W2 + F, 0:H]
        v = base + L_VEC
        bqkv = const_ref[v + 0:v + 1, 0:3 * H]
        bo = const_ref[v + 1:v + 2, 0:H]
        b1 = const_ref[v + 2:v + 3, 0:F]
        b2 = const_ref[v + 3:v + 4, 0:H]
        ln1g = const_ref[v + 4:v + 5, 0:H]
        ln1b = const_ref[v + 5:v + 6, 0:H]
        ln2g = const_ref[v + 6:v + 7, 0:H]
        ln2b = const_ref[v + 7:v + 8, 0:H]

        # fused QKV projection (1/sqrt(DH) already folded into Q weights/bias)
        qkv = jnp.dot(x, wqkv, preferred_element_type=f32) + bqkv    # (ROWS, 3H)
        q = qkv[:, 0:H]
        kv = qkv[:, H:3 * H]                                         # (ROWS, 2H)

        # ONE replication matmul for both K and V, then slice + head mask
        kv_sel = jnp.dot(rep, kv, preferred_element_type=f32)        # (KCOLS, 2H)
        k_sel = kv_sel[:, 0:H] * head_mask
        v_sel = kv_sel[:, H:2 * H] * head_mask

        # all (batch, head) attention scores in ONE matmul: (ROWS, KCOLS)
        s = jnp.einsum('qd,kd->qk', q, k_sel, preferred_element_type=f32) + bias

        # segmented softmax: per-row global max is a valid shift for every
        # (batch, head) block; per-block sums via one matmul; EUP reciprocal.
        s = s - jnp.max(s, axis=-1, keepdims=True)
        p = jnp.exp(s)
        denom = jnp.dot(p, blk_sum, preferred_element_type=f32)
        p = p * pl.reciprocal(denom + 1e-20, approx=True)

        # context for all heads at once; head_mask keeps lanes separated
        ctx = jnp.dot(p, v_sel, preferred_element_type=f32)          # (ROWS, H)

        attn_out = jnp.dot(ctx, wo, preferred_element_type=f32) + bo
        x1 = _layernorm(x + attn_out, ln1g, ln1b)

        hmid = jnp.dot(x1, w1, preferred_element_type=f32) + b1
        # TODO(synk): BERT uses exact erf-GELU; tanh approximation used here.
        hmid = jax.nn.gelu(hmid, approximate=True)
        ffn = jnp.dot(hmid, w2, preferred_element_type=f32) + b2
        x = _layernorm(x1 + ffn, ln2g, ln2b)

    # ----- classifier on the CLS rows (VPU reduce instead of a 3rd matmul) -----
    cls = jnp.dot(cls_sel, x, preferred_element_type=f32)            # (B, H)
    out_ref[...] = jnp.sum(cls * clsw, axis=-1, keepdims=True) + clsb  # (B, 1)


# -------------------------------- wrapper -------------------------------------
def run_bert_fused(dyn_buf, const_buf):
    return pl.pallas_call(
        bert_fused_kernel,
        out_shape=jax.ShapeDtypeStruct((B, 1), jnp.float32),
        grid=(1,),
        in_specs=[pl.BlockSpec((DYN_ROWS, LANES), lambda i: (0, 0)),
                  pl.BlockSpec((CONST_ROWS, LANES), lambda i: (0, 0))],
        out_specs=pl.BlockSpec((B, 1), lambda i: (0, 0)),
        compiler_params=pltpu.CompilerParams(
            dimension_semantics=("arbitrary",)),   # tiny: keep on one core
    )(dyn_buf, const_buf)


# ----------------------- host-side constants & packing ------------------------
def _selector_constants():
    ri = jnp.arange(KCOLS)[:, None]
    # rep: (KCOLS, ROWS); rep[(b*NH+h)*S+s, b*S+s] = 1  (per-head K/V replication)
    cj = jnp.arange(ROWS)[None, :]
    rep = ((ri // (NH * S) == cj // S) & (ri % S == cj % S)).astype(jnp.float32)
    # head_mask: (KCOLS, H); keep lane c of replicated row r iff same head.
    hj = jnp.arange(H)[None, :]
    head_mask = ((ri // S) % NH == hj // DH).astype(jnp.float32)
    # blk_sum: (KCOLS, KCOLS); 1 iff same (batch, head) block of S key columns.
    bj = jnp.arange(KCOLS)[None, :]
    blk_sum = (ri // S == bj // S).astype(jnp.float32)
    # cls_sel: (B, ROWS); picks row b*S (the CLS token) of each batch element.
    si = jnp.arange(B)[:, None]
    sj = jnp.arange(ROWS)[None, :]
    cls_sel = (sj == si * S).astype(jnp.float32)
    return rep, head_mask, blk_sum, cls_sel


def pack_constants(p):
    """Build the single (CONST_ROWS, 128) parameter/constant slab (once)."""
    rep, head_mask, blk_sum, cls_sel = _selector_constants()
    buf = jnp.zeros((CONST_ROWS, LANES), jnp.float32)

    def put2(b, r, a):
        return b.at[r:r + a.shape[0], :a.shape[1]].set(a)

    def put1(b, r, vec):
        return b.at[r, :vec.shape[0]].set(vec)

    buf = put2(buf, R_REP, rep)
    buf = put2(buf, R_HMASK, head_mask)
    buf = put2(buf, R_BLK, blk_sum)
    buf = put2(buf, R_CLS_SEL, cls_sel)
    buf = put1(buf, R_EMB_LN, p['emb_ln_g'])
    buf = put1(buf, R_EMB_LN + 1, p['emb_ln_b'])
    buf = put1(buf, R_CLS_HEAD, p['cls_w'][0])
    buf = put1(buf, R_CLS_HEAD + 1, p['cls_b'])
    for l, lp in enumerate(p['layers']):
        base = R_LAYER0 + l * LAYER_ROWS
        buf = put2(buf, base + L_WQKV, lp['wqkv'])
        buf = put2(buf, base + L_WO, lp['wo'])
        buf = put2(buf, base + L_W1, lp['w1'])
        buf = put2(buf, base + L_W2, lp['w2'])
        vrow = base + L_VEC
        buf = put1(buf, vrow + 0, lp['bqkv'])
        buf = put1(buf, vrow + 1, lp['bo'])
        buf = put1(buf, vrow + 2, lp['b1'])
        buf = put1(buf, vrow + 3, lp['b2'])
        buf = put1(buf, vrow + 4, lp['ln1g'])
        buf = put1(buf, vrow + 5, lp['ln1b'])
        buf = put1(buf, vrow + 6, lp['ln2g'])
        buf = put1(buf, vrow + 7, lp['ln2b'])
    return buf


# --------------------------- parameter init (deterministic) -------------------
def init_params(key):
    keys = iter(jax.random.split(key, 64))

    def nrm(shape, scale=0.05):
        return jax.random.normal(next(keys), shape, jnp.float32) * scale

    attn_scale = 1.0 / math.sqrt(DH)
    layers = []
    for _ in range(NLAYERS):
        wq, wk, wv = nrm((H, H)), nrm((H, H)), nrm((H, H))
        bq = jnp.zeros((H,), jnp.float32)
        # fold 1/sqrt(DH) into the Q columns (one-time host constant fold)
        wqkv = jnp.concatenate([wq * attn_scale, wk, wv], axis=1)      # (H, 3H)
        bqkv = jnp.concatenate([bq * attn_scale,
                                jnp.zeros((2 * H,), jnp.float32)])     # (3H,)
        layers.append(dict(
            wqkv=wqkv, bqkv=bqkv,
            wo=nrm((H, H)), bo=jnp.zeros((H,), jnp.float32),
            ln1g=jnp.ones((H,), jnp.float32), ln1b=jnp.zeros((H,), jnp.float32),
            w1=nrm((H, F)), b1=jnp.zeros((F,), jnp.float32),
            w2=nrm((F, H)), b2=jnp.zeros((H,), jnp.float32),
            ln2g=jnp.ones((H,), jnp.float32), ln2b=jnp.zeros((H,), jnp.float32),
        ))

    return {
        'word_emb': nrm((VOCAB, H)),
        'pos_emb': nrm((MAX_POS, H)),
        'type_emb': nrm((2, H)),
        'emb_ln_g': jnp.ones((H,), jnp.float32),
        'emb_ln_b': jnp.zeros((H,), jnp.float32),
        'cls_w': nrm((1, H)),                 # nn.Linear(H, 1) weight
        'cls_b': jnp.zeros((1,), jnp.float32),
        'layers': layers,
    }


# ------------------------------- forward pass ---------------------------------
def bert_sentence_classifier(params, const_buf, input_ids, attention_mask):
    # Embedding gather is plain-JAX glue (word + position + token_type 0),
    # already flattened to (B*S, H) so the kernel stays purely 2-D.
    ids = input_ids.reshape(-1)
    emb = (jnp.take(params['word_emb'], ids, axis=0)
           + jnp.tile(params['pos_emb'][:S], (B, 1))
           + params['type_emb'][0][None, :])                          # (B*S, H)

    # Additive attention bias over flattened (batch, head, key) columns:
    #   same batch & valid key -> 0 ; same batch & padded key -> -10000 ;
    #   other batch            -> -1e9 (fully suppressed).
    am = attention_mask.astype(jnp.float32)                           # (B, S)
    r_batch = jnp.arange(ROWS) // S
    c_batch = jnp.arange(KCOLS) // (NH * S)
    c_key = jnp.arange(KCOLS) % S
    key_pad = (1.0 - am[c_batch, c_key]) * -10000.0                   # (KCOLS,)
    attn_bias = jnp.where(r_batch[:, None] == c_batch[None, :],
                          key_pad[None, :], -1e9).astype(jnp.float32)

    # Pack per-call dynamic data into one lane-dense slab -> single DMA.
    dyn = jnp.zeros((DYN_ROWS, LANES), jnp.float32)
    dyn = dyn.at[0:ROWS, 0:H].set(emb)
    dyn = dyn.at[ROWS:2 * ROWS, 0:KCOLS].set(attn_bias)

    logits = run_bert_fused(dyn, const_buf)                           # (B, 1)
    return logits[:, 0]                                               # (B,)


# ----------------------------------- main --------------------------------------
if __name__ == "__main__":
    key = jax.random.PRNGKey(0)
    pkey, ikey = jax.random.split(key)
    params = init_params(pkey)
    const_buf = pack_constants(params)     # built once, reused every call

    input_ids = jax.random.randint(ikey, (B, S), 0, VOCAB, dtype=jnp.int32)
    attention_mask = jnp.array(
        [[1, 1, 1, 1, 1, 1, 1, 1],
         [1, 1, 1, 1, 1, 1, 0, 0]], dtype=jnp.int32)

    forward = jax.jit(bert_sentence_classifier)
    logits = forward(params, const_buf, input_ids, attention_mask)
    logits = jax.block_until_ready(logits)
    assert logits.shape == (B,)
    print("KERNEL_OK")
</pallas_src>

<mosaic_0001>
module attributes {stable_mosaic.version = 11 : i64} {
  func.func @bert_fused_kernel(%arg0: i32, %arg1: memref<32x128xf32, #tpu.memory_space<vmem>>, %arg2: memref<552x128xf32, #tpu.memory_space<vmem>>, %arg3: memref<2x1xf32, #tpu.memory_space<vmem>>) attributes {dimension_semantics = [#tpu.dimension_semantics<arbitrary>], iteration_bounds = array<i64: 1>, scalar_prefetch = 0 : i64, scratch_operands = 0 : i64, tpu.core_type = #tpu.core_type<tc>, window_params = [{pipeline_mode = #tpu.pipeline_mode<synchronous>, transform_indices = @transform_0, window_bounds = array<i64: 32, 128>}, {pipeline_mode = #tpu.pipeline_mode<synchronous>, transform_indices = @transform_1, window_bounds = array<i64: 552, 128>}, {pipeline_mode = #tpu.pipeline_mode<synchronous>, transform_indices = @transform_2, window_bounds = array<i64: 2, 1>}]} {
    %c0 = arith.constant 0 : index
    %c0_0 = arith.constant 0 : index
    %0 = vector.load %arg1[%c0, %c0_0] : memref<32x128xf32, #tpu.memory_space<vmem>>, vector<16x32xf32>
    %c16 = arith.constant 16 : index
    %c0_1 = arith.constant 0 : index
    %1 = vector.load %arg1[%c16, %c0_1] : memref<32x128xf32, #tpu.memory_space<vmem>>, vector<16x64xf32>
    %c0_2 = arith.constant 0 : index
    %c0_3 = arith.constant 0 : index
    %2 = vector.load %arg2[%c0_2, %c0_3] : memref<552x128xf32, #tpu.memory_space<vmem>>, vector<64x16xf32>
    %c64 = arith.constant 64 : index
    %c0_4 = arith.constant 0 : index
    %3 = vector.load %arg2[%c64, %c0_4] : memref<552x128xf32, #tpu.memory_space<vmem>>, vector<64x32xf32>
    %c128 = arith.constant 128 : index
    %c0_5 = arith.constant 0 : index
    %4 = vector.load %arg2[%c128, %c0_5] : memref<552x128xf32, #tpu.memory_space<vmem>>, vector<64x64xf32>
    %c192 = arith.constant 192 : index
    %c0_6 = arith.constant 0 : index
    %5 = vector.load %arg2[%c192, %c0_6] : memref<552x128xf32, #tpu.memory_space<vmem>>, vector<2x16xf32>
    %c200 = arith.constant 200 : index
    %c0_7 = arith.constant 0 : index
    %6 = vector.load %arg2[%c200, %c0_7] : memref<552x128xf32, #tpu.memory_space<vmem>>, vector<1x32xf32>
    %c201 = arith.constant 201 : index
    %c0_8 = arith.constant 0 : index
    %7 = vector.load %arg2[%c201, %c0_8] : memref<552x128xf32, #tpu.memory_space<vmem>>, vector<1x32xf32>
    %c208 = arith.constant 208 : index
    %c0_9 = arith.constant 0 : index
    %8 = vector.load %arg2[%c208, %c0_9] : memref<552x128xf32, #tpu.memory_space<vmem>>, vector<1x32xf32>
    %c209 = arith.constant 209 : index
    %c0_10 = arith.constant 0 : index
    %9 = vector.load %arg2[%c209, %c0_10] : memref<552x128xf32, #tpu.memory_space<vmem>>, vector<1x1xf32>
    %cst = arith.constant dense<0.000000e+00> : vector<16xf32>
    %10 = vector.multi_reduction <add>, %0, %cst [1] : vector<16x32xf32> to vector<16xf32>
    %11 = vector.shape_cast %10 : vector<16xf32> to vector<16x1xf32>
    %cst_11 = arith.constant 3.200000e+01 : f32
    %12 = vector.broadcast %cst_11 : f32 to vector<16x1xf32>
    %13 = arith.divf %11, %12 : vector<16x1xf32>
    %14 = vector.broadcast %13 : vector<16x1xf32> to vector<16x32xf32>
    %15 = arith.subf %0, %14 : vector<16x32xf32>
    %16 = arith.mulf %15, %15 : vector<16x32xf32>
    %cst_12 = arith.constant dense<0.000000e+00> : vector<16xf32>
    %17 = vector.multi_reduction <add>, %16, %cst_12 [1] : vector<16x32xf32> to vector<16xf32>
    %18 = vector.shape_cast %17 : vector<16xf32> to vector<16x1xf32>
    %cst_13 = arith.constant 3.200000e+01 : f32
    %19 = vector.broadcast %cst_13 : f32 to vector<16x1xf32>
    %20 = arith.divf %18, %19 : vector<16x1xf32>
    %21 = vector.broadcast %13 : vector<16x1xf32> to vector<16x32xf32>
    %22 = arith.subf %0, %21 : vector<16x32xf32>
    %cst_14 = arith.constant 9.99999996E-13 : f32
    %23 = vector.broadcast %cst_14 : f32 to vector<16x1xf32>
    %24 = arith.addf %20, %23 : vector<16x1xf32>
    %25 = math.rsqrt %24 : vector<16x1xf32>
    %26 = vector.broadcast %25 : vector<16x1xf32> to vector<16x32xf32>
    %27 = arith.mulf %22, %26 : vector<16x32xf32>
    %28 = vector.broadcast %6 : vector<1x32xf32> to vector<16x32xf32>
    %29 = arith.mulf %27, %28 : vector<16x32xf32>
    %30 = vector.broadcast %7 : vector<1x32xf32> to vector<16x32xf32>
    %31 = arith.addf %29, %30 : vector<16x32xf32>
    %c216 = arith.constant 216 : index
    %c0_15 = arith.constant 0 : index
    %32 = vector.load %arg2[%c216, %c0_15] : memref<552x128xf32, #tpu.memory_space<vmem>>, vector<32x96xf32>
    %c248 = arith.constant 248 : index
    %c0_16 = arith.constant 0 : index
    %33 = vector.load %arg2[%c248, %c0_16] : memref<552x128xf32, #tpu.memory_space<vmem>>, vector<32x32xf32>
    %c280 = arith.constant 280 : index
    %c0_17 = arith.constant 0 : index
    %34 = vector.load %arg2[%c280, %c0_17] : memref<552x128xf32, #tpu.memory_space<vmem>>, vector<32x64xf32>
    %c312 = arith.constant 312 : index
    %c0_18 = arith.constant 0 : index
    %35 = vector.load %arg2[%c312, %c0_18] : memref<552x128xf32, #tpu.memory_space<vmem>>, vector<64x32xf32>
    %c376 = arith.constant 376 : index
    %c0_19 = arith.constant 0 : index
    %36 = vector.load %arg2[%c376, %c0_19] : memref<552x128xf32, #tpu.memory_space<vmem>>, vector<1x96xf32>
    %c377 = arith.constant 377 : index
    %c0_20 = arith.constant 0 : index
    %37 = vector.load %arg2[%c377, %c0_20] : memref<552x128xf32, #tpu.memory_space<vmem>>, vector<1x32xf32>
    %c378 = arith.constant 378 : index
    %c0_21 = arith.constant 0 : index
    %38 = vector.load %arg2[%c378, %c0_21] : memref<552x128xf32, #tpu.memory_space<vmem>>, vector<1x64xf32>
    %c379 = arith.constant 379 : index
    %c0_22 = arith.constant 0 : index
    %39 = vector.load %arg2[%c379, %c0_22] : memref<552x128xf32, #tpu.memory_space<vmem>>, vector<1x32xf32>
    %c380 = arith.constant 380 : index
    %c0_23 = arith.constant 0 : index
    %40 = vector.load %arg2[%c380, %c0_23] : memref<552x128xf32, #tpu.memory_space<vmem>>, vector<1x32xf32>
    %c381 = arith.constant 381 : index
    %c0_24 = arith.constant 0 : index
    %41 = vector.load %arg2[%c381, %c0_24] : memref<552x128xf32, #tpu.memory_space<vmem>>, vector<1x32xf32>
    %c382 = arith.constant 382 : index
    %c0_25 = arith.constant 0 : index
    %42 = vector.load %arg2[%c382, %c0_25] : memref<552x128xf32, #tpu.memory_space<vmem>>, vector<1x32xf32>
    %c383 = arith.constant 383 : index
    %c0_26 = arith.constant 0 : index
    %43 = vector.load %arg2[%c383, %c0_26] : memref<552x128xf32, #tpu.memory_space<vmem>>, vector<1x32xf32>
    %cst_27 = arith.constant dense<0.000000e+00> : vector<16x96xf32>
    %44 = tpu.matmul %31, %32, %cst_27 {dimension_numbers = #tpu.dot_dimension_numbers<[1], [0], [0], [1], [0, 0, 1, 1], [], []>} : vector<16x32xf32>, vector<32x96xf32>, vector<16x96xf32> -> vector<16x96xf32>
    %45 = vector.broadcast %36 : vector<1x96xf32> to vector<16x96xf32>
    %46 = arith.addf %44, %45 : vector<16x96xf32>
    %47 = vector.extract_strided_slice %46 {offsets = [0, 0], sizes = [16, 32], strides = [1, 1]} : vector<16x96xf32> to vector<16x32xf32>
    %48 = vector.extract_strided_slice %46 {offsets = [0, 32], sizes = [16, 64], strides = [1, 1]} : vector<16x96xf32> to vector<16x64xf32>
    %cst_28 = arith.constant dense<0.000000e+00> : vector<64x64xf32>
    %49 = tpu.matmul %2, %48, %cst_28 {dimension_numbers = #tpu.dot_dimension_numbers<[1], [0], [0], [1], [0, 0, 1, 1], [], []>} : vector<64x16xf32>, vector<16x64xf32>, vector<64x64xf32> -> vector<64x64xf32>
    %50 = vector.extract_strided_slice %49 {offsets = [0, 0], sizes = [64, 32], strides = [1, 1]} : vector<64x64xf32> to vector<64x32xf32>
    %51 = arith.mulf %50, %3 : vector<64x32xf32>
    %52 = vector.extract_strided_slice %49 {offsets = [0, 32], sizes = [64, 32], strides = [1, 1]} : vector<64x64xf32> to vector<64x32xf32>
    %53 = arith.mulf %52, %3 : vector<64x32xf32>
    "tpu.trace_start"() <{level = 10 : i32, message = "qd,kd->qk"}> : () -> ()
    %cst_29 = arith.constant dense<0.000000e+00> : vector<16x64xf32>
    %54 = tpu.matmul %47, %51, %cst_29 {dimension_numbers = #tpu.dot_dimension_numbers<[1], [1], [0], [0], [0, 0, 1, 0], [], []>} : vector<16x32xf32>, vector<64x32xf32>, vector<16x64xf32> -> vector<16x64xf32>
    "tpu.trace_stop"() : () -> ()
    %55 = arith.addf %54, %1 : vector<16x64xf32>
    %cst_30 = arith.constant dense<0xFF800000> : vector<16xf32>
    %56 = vector.multi_reduction <maximumf>, %55, %cst_30 [1] : vector<16x64xf32> to vector<16xf32>
    %57 = vector.shape_cast %56 : vector<16xf32> to vector<16x1xf32>
    %58 = vector.broadcast %57 : vector<16x1xf32> to vector<16x64xf32>
    %59 = arith.subf %55, %58 : vector<16x64xf32>
    %60 = math.exp %59 : vector<16x64xf32>
    %cst_31 = arith.constant dense<0.000000e+00> : vector<16x64xf32>
    %61 = tpu.matmul %60, %4, %cst_31 {dimension_numbers = #tpu.dot_dimension_numbers<[1], [0], [0], [1], [0, 0, 1, 1], [], []>} : vector<16x64xf32>, vector<64x64xf32>, vector<16x64xf32> -> vector<16x64xf32>
    %cst_32 = arith.constant 9.99999968E-21 : f32
    %62 = vector.broadcast %cst_32 : f32 to vector<16x64xf32>
    %63 = arith.addf %61, %62 : vector<16x64xf32>
    %64 = tpu.reciprocal %63 {approx = true} : vector<16x64xf32> -> vector<16x64xf32>
    %65 = arith.mulf %60, %64 : vector<16x64xf32>
    %cst_33 = arith.constant dense<0.000000e+00> : vector<16x32xf32>
    %66 = tpu.matmul %65, %53, %cst_33 {dimension_numbers = #tpu.dot_dimension_numbers<[1], [0], [0], [1], [0, 0, 1, 1], [], []>} : vector<16x64xf32>, vector<64x32xf32>, vector<16x32xf32> -> vector<16x32xf32>
    %cst_34 = arith.constant dense<0.000000e+00> : vector<16x32xf32>
    %67 = tpu.matmul %66, %33, %cst_34 {dimension_numbers = #tpu.dot_dimension_numbers<[1], [0], [0], [1], [0, 0, 1, 1], [], []>} : vector<16x32xf32>, vector<32x32xf32>, vector<16x32xf32> -> vector<16x32xf32>
    %68 = vector.broadcast %37 : vector<1x32xf32> to vector<16x32xf32>
    %69 = arith.addf %67, %68 : vector<16x32xf32>
    %70 = arith.addf %31, %69 : vector<16x32xf32>
    %cst_35 = arith.constant dense<0.000000e+00> : vector<16xf32>
    %71 = vector.multi_reduction <add>, %70, %cst_35 [1] : vector<16x32xf32> to vector<16xf32>
    %72 = vector.shape_cast %71 : vector<16xf32> to vector<16x1xf32>
    %cst_36 = arith.constant 3.200000e+01 : f32
    %73 = vector.broadcast %cst_36 : f32 to vector<16x1xf32>
    %74 = arith.divf %72, %73 : vector<16x1xf32>
    %75 = vector.broadcast %74 : vector<16x1xf32> to vector<16x32xf32>
    %76 = arith.subf %70, %75 : vector<16x32xf32>
    %77 = arith.mulf %76, %76 : vector<16x32xf32>
    %cst_37 = arith.constant dense<0.000000e+00> : vector<16xf32>
    %78 = vector.multi_reduction <add>, %77, %cst_37 [1] : vector<16x32xf32> to vector<16xf32>
    %79 = vector.shape_cast %78 : vector<16xf32> to vector<16x1xf32>
    %cst_38 = arith.constant 3.200000e+01 : f32
    %80 = vector.broadcast %cst_38 : f32 to vector<16x1xf32>
    %81 = arith.divf %79, %80 : vector<16x1xf32>
    %82 = vector.broadcast %74 : vector<16x1xf32> to vector<16x32xf32>
    %83 = arith.subf %70, %82 : vector<16x32xf32>
    %cst_39 = arith.constant 9.99999996E-13 : f32
    %84 = vector.broadcast %cst_39 : f32 to vector<16x1xf32>
    %85 = arith.addf %81, %84 : vector<16x1xf32>
    %86 = math.rsqrt %85 : vector<16x1xf32>
    %87 = vector.broadcast %86 : vector<16x1xf32> to vector<16x32xf32>
    %88 = arith.mulf %83, %87 : vector<16x32xf32>
    %89 = vector.broadcast %40 : vector<1x32xf32> to vector<16x32xf32>
    %90 = arith.mulf %88, %89 : vector<16x32xf32>
    %91 = vector.broadcast %41 : vector<1x32xf32> to vector<16x32xf32>
    %92 = arith.addf %90, %91 : vector<16x32xf32>
    %cst_40 = arith.constant dense<0.000000e+00> : vector<16x64xf32>
    %93 = tpu.matmul %92, %34, %cst_40 {dimension_numbers = #tpu.dot_dimension_numbers<[1], [0], [0], [1], [0, 0, 1, 1], [], []>} : vector<16x32xf32>, vector<32x64xf32>, vector<16x64xf32> -> vector<16x64xf32>
    %94 = vector.broadcast %38 : vector<1x64xf32> to vector<16x64xf32>
    %95 = arith.addf %93, %94 : vector<16x64xf32>
    %96 = arith.mulf %95, %95 : vector<16x64xf32>
    %97 = arith.mulf %95, %96 : vector<16x64xf32>
    %cst_41 = arith.constant 4.471500e-02 : f32
    %98 = vector.broadcast %cst_41 : f32 to vector<16x64xf32>
    %99 = arith.mulf %98, %97 : vector<16x64xf32>
    %100 = arith.addf %95, %99 : vector<16x64xf32>
    %cst_42 = arith.constant 0.797884583 : f32
    %101 = vector.broadcast %cst_42 : f32 to vector<16x64xf32>
    %102 = arith.mulf %101, %100 : vector<16x64xf32>
    %103 = math.tanh %102 : vector<16x64xf32>
    %cst_43 = arith.constant 1.000000e+00 : f32
    %104 = vector.broadcast %cst_43 : f32 to vector<16x64xf32>
    %105 = arith.addf %104, %103 : vector<16x64xf32>
    %cst_44 = arith.constant 5.000000e-01 : f32
    %106 = vector.broadcast %cst_44 : f32 to vector<16x64xf32>
    %107 = arith.mulf %106, %105 : vector<16x64xf32>
    %108 = arith.mulf %95, %107 : vector<16x64xf32>
    %cst_45 = arith.constant dense<0.000000e+00> : vector<16x32xf32>
    %109 = tpu.matmul %108, %35, %cst_45 {dimension_numbers = #tpu.dot_dimension_numbers<[1], [0], [0], [1], [0, 0, 1, 1], [], []>} : vector<16x64xf32>, vector<64x32xf32>, vector<16x32xf32> -> vector<16x32xf32>
    %110 = vector.broadcast %39 : vector<1x32xf32> to vector<16x32xf32>
    %111 = arith.addf %109, %110 : vector<16x32xf32>
    %112 = arith.addf %92, %111 : vector<16x32xf32>
    %cst_46 = arith.constant dense<0.000000e+00> : vector<16xf32>
    %113 = vector.multi_reduction <add>, %112, %cst_46 [1] : vector<16x32xf32> to vector<16xf32>
    %114 = vector.shape_cast %113 : vector<16xf32> to vector<16x1xf32>
    %cst_47 = arith.constant 3.200000e+01 : f32
    %115 = vector.broadcast %cst_47 : f32 to vector<16x1xf32>
    %116 = arith.divf %114, %115 : vector<16x1xf32>
    %117 = vector.broadcast %116 : vector<16x1xf32> to vector<16x32xf32>
    %118 = arith.subf %112, %117 : vector<16x32xf32>
    %119 = arith.mulf %118, %118 : vector<16x32xf32>
    %cst_48 = arith.constant dense<0.000000e+00> : vector<16xf32>
    %120 = vector.multi_reduction <add>, %119, %cst_48 [1] : vector<16x32xf32> to vector<16xf32>
    %121 = vector.shape_cast %120 : vector<16xf32> to vector<16x1xf32>
    %cst_49 = arith.constant 3.200000e+01 : f32
    %122 = vector.broadcast %cst_49 : f32 to vector<16x1xf32>
    %123 = arith.divf %121, %122 : vector<16x1xf32>
    %124 = vector.broadcast %116 : vector<16x1xf32> to vector<16x32xf32>
    %125 = arith.subf %112, %124 : vector<16x32xf32>
    %cst_50 = arith.constant 9.99999996E-13 : f32
    %126 = vector.broadcast %cst_50 : f32 to vector<16x1xf32>
    %127 = arith.addf %123, %126 : vector<16x1xf32>
    %128 = math.rsqrt %127 : vector<16x1xf32>
    %129 = vector.broadcast %128 : vector<16x1xf32> to vector<16x32xf32>
    %130 = arith.mulf %125, %129 : vector<16x32xf32>
    %131 = vector.broadcast %42 : vector<1x32xf32> to vector<16x32xf32>
    %132 = arith.mulf %130, %131 : vector<16x32xf32>
    %133 = vector.broadcast %43 : vector<1x32xf32> to vector<16x32xf32>
    %134 = arith.addf %132, %133 : vector<16x32xf32>
    %c384 = arith.constant 384 : index
    %c0_51 = arith.constant 0 : index
    %135 = vector.load %arg2[%c384, %c0_51] : memref<552x128xf32, #tpu.memory_space<vmem>>, vector<32x96xf32>
    %c416 = arith.constant 416 : index
    %c0_52 = arith.constant 0 : index
    %136 = vector.load %arg2[%c416, %c0_52] : memref<552x128xf32, #tpu.memory_space<vmem>>, vector<32x32xf32>
    %c448 = arith.constant 448 : index
    %c0_53 = arith.constant 0 : index
    %137 = vector.load %arg2[%c448, %c0_53] : memref<552x128xf32, #tpu.memory_space<vmem>>, vector<32x64xf32>
    %c480 = arith.constant 480 : index
    %c0_54 = arith.constant 0 : index
    %138 = vector.load %arg2[%c480, %c0_54] : memref<552x128xf32, #tpu.memory_space<vmem>>, vector<64x32xf32>
    %c544 = arith.constant 544 : index
    %c0_55 = arith.constant 0 : index
    %139 = vector.load %arg2[%c544, %c0_55] : memref<552x128xf32, #tpu.memory_space<vmem>>, vector<1x96xf32>
    %c545 = arith.constant 545 : index
    %c0_56 = arith.constant 0 : index
    %140 = vector.load %arg2[%c545, %c0_56] : memref<552x128xf32, #tpu.memory_space<vmem>>, vector<1x32xf32>
    %c546 = arith.constant 546 : index
    %c0_57 = arith.constant 0 : index
    %141 = vector.load %arg2[%c546, %c0_57] : memref<552x128xf32, #tpu.memory_space<vmem>>, vector<1x64xf32>
    %c547 = arith.constant 547 : index
    %c0_58 = arith.constant 0 : index
    %142 = vector.load %arg2[%c547, %c0_58] : memref<552x128xf32, #tpu.memory_space<vmem>>, vector<1x32xf32>
    %c548 = arith.constant 548 : index
    %c0_59 = arith.constant 0 : index
    %143 = vector.load %arg2[%c548, %c0_59] : memref<552x128xf32, #tpu.memory_space<vmem>>, vector<1x32xf32>
    %c549 = arith.constant 549 : index
    %c0_60 = arith.constant 0 : index
    %144 = vector.load %arg2[%c549, %c0_60] : memref<552x128xf32, #tpu.memory_space<vmem>>, vector<1x32xf32>
    %c550 = arith.constant 550 : index
    %c0_61 = arith.constant 0 : index
    %145 = vector.load %arg2[%c550, %c0_61] : memref<552x128xf32, #tpu.memory_space<vmem>>, vector<1x32xf32>
    %c551 = arith.constant 551 : index
    %c0_62 = arith.constant 0 : index
    %146 = vector.load %arg2[%c551, %c0_62] : memref<552x128xf32, #tpu.memory_space<vmem>>, vector<1x32xf32>
    %cst_63 = arith.constant dense<0.000000e+00> : vector<16x96xf32>
    %147 = tpu.matmul %134, %135, %cst_63 {dimension_numbers = #tpu.dot_dimension_numbers<[1], [0], [0], [1], [0, 0, 1, 1], [], []>} : vector<16x32xf32>, vector<32x96xf32>, vector<16x96xf32> -> vector<16x96xf32>
    %148 = vector.broadcast %139 : vector<1x96xf32> to vector<16x96xf32>
    %149 = arith.addf %147, %148 : vector<16x96xf32>
    %150 = vector.extract_strided_slice %149 {offsets = [0, 0], sizes = [16, 32], strides = [1, 1]} : vector<16x96xf32> to vector<16x32xf32>
    %151 = vector.extract_strided_slice %149 {offsets = [0, 32], sizes = [16, 64], strides = [1, 1]} : vector<16x96xf32> to vector<16x64xf32>
    %cst_64 = arith.constant dense<0.000000e+00> : vector<64x64xf32>
    %152 = tpu.matmul %2, %151, %cst_64 {dimension_numbers = #tpu.dot_dimension_numbers<[1], [0], [0], [1], [0, 0, 1, 1], [], []>} : vector<64x16xf32>, vector<16x64xf32>, vector<64x64xf32> -> vector<64x64xf32>
    %153 = vector.extract_strided_slice %152 {offsets = [0, 0], sizes = [64, 32], strides = [1, 1]} : vector<64x64xf32> to vector<64x32xf32>
    %154 = arith.mulf %153, %3 : vector<64x32xf32>
    %155 = vector.extract_strided_slice %152 {offsets = [0, 32], sizes = [64, 32], strides = [1, 1]} : vector<64x64xf32> to vector<64x32xf32>
    %156 = arith.mulf %155, %3 : vector<64x32xf32>
    "tpu.trace_start"() <{level = 10 : i32, message = "qd,kd->qk"}> : () -> ()
    %cst_65 = arith.constant dense<0.000000e+00> : vector<16x64xf32>
    %157 = tpu.matmul %150, %154, %cst_65 {dimension_numbers = #tpu.dot_dimension_numbers<[1], [1], [0], [0], [0, 0, 1, 0], [], []>} : vector<16x32xf32>, vector<64x32xf32>, vector<16x64xf32> -> vector<16x64xf32>
    "tpu.trace_stop"() : () -> ()
    %158 = arith.addf %157, %1 : vector<16x64xf32>
    %cst_66 = arith.constant dense<0xFF800000> : vector<16xf32>
    %159 = vector.multi_reduction <maximumf>, %158, %cst_66 [1] : vector<16x64xf32> to vector<16xf32>
    %160 = vector.shape_cast %159 : vector<16xf32> to vector<16x1xf32>
    %161 = vector.broadcast %160 : vector<16x1xf32> to vector<16x64xf32>
    %162 = arith.subf %158, %161 : vector<16x64xf32>
    %163 = math.exp %162 : vector<16x64xf32>
    %cst_67 = arith.constant dense<0.000000e+00> : vector<16x64xf32>
    %164 = tpu.matmul %163, %4, %cst_67 {dimension_numbers = #tpu.dot_dimension_numbers<[1], [0], [0], [1], [0, 0, 1, 1], [], []>} : vector<16x64xf32>, vector<64x64xf32>, vector<16x64xf32> -> vector<16x64xf32>
    %cst_68 = arith.constant 9.99999968E-21 : f32
    %165 = vector.broadcast %cst_68 : f32 to vector<16x64xf32>
    %166 = arith.addf %164, %165 : vector<16x64xf32>
    %167 = tpu.reciprocal %166 {approx = true} : vector<16x64xf32> -> vector<16x64xf32>
    %168 = arith.mulf %163, %167 : vector<16x64xf32>
    %cst_69 = arith.constant dense<0.000000e+00> : vector<16x32xf32>
    %169 = tpu.matmul %168, %156, %cst_69 {dimension_numbers = #tpu.dot_dimension_numbers<[1], [0], [0], [1], [0, 0, 1, 1], [], []>} : vector<16x64xf32>, vector<64x32xf32>, vector<16x32xf32> -> vector<16x32xf32>
    %cst_70 = arith.constant dense<0.000000e+00> : vector<16x32xf32>
    %170 = tpu.matmul %169, %136, %cst_70 {dimension_numbers = #tpu.dot_dimension_numbers<[1], [0], [0], [1], [0, 0, 1, 1], [], []>} : vector<16x32xf32>, vector<32x32xf32>, vector<16x32xf32> -> vector<16x32xf32>
    %171 = vector.broadcast %140 : vector<1x32xf32> to vector<16x32xf32>
    %172 = arith.addf %170, %171 : vector<16x32xf32>
    %173 = arith.addf %134, %172 : vector<16x32xf32>
    %cst_71 = arith.constant dense<0.000000e+00> : vector<16xf32>
    %174 = vector.multi_reduction <add>, %173, %cst_71 [1] : vector<16x32xf32> to vector<16xf32>
    %175 = vector.shape_cast %174 : vector<16xf32> to vector<16x1xf32>
    %cst_72 = arith.constant 3.200000e+01 : f32
    %176 = vector.broadcast %cst_72 : f32 to vector<16x1xf32>
    %177 = arith.divf %175, %176 : vector<16x1xf32>
    %178 = vector.broadcast %177 : vector<16x1xf32> to vector<16x32xf32>
    %179 = arith.subf %173, %178 : vector<16x32xf32>
    %180 = arith.mulf %179, %179 : vector<16x32xf32>
    %cst_73 = arith.constant dense<0.000000e+00> : vector<16xf32>
    %181 = vector.multi_reduction <add>, %180, %cst_73 [1] : vector<16x32xf32> to vector<16xf32>
    %182 = vector.shape_cast %181 : vector<16xf32> to vector<16x1xf32>
    %cst_74 = arith.constant 3.200000e+01 : f32
    %183 = vector.broadcast %cst_74 : f32 to vector<16x1xf32>
    %184 = arith.divf %182, %183 : vector<16x1xf32>
    %185 = vector.broadcast %177 : vector<16x1xf32> to vector<16x32xf32>
    %186 = arith.subf %173, %185 : vector<16x32xf32>
    %cst_75 = arith.constant 9.99999996E-13 : f32
    %187 = vector.broadcast %cst_75 : f32 to vector<16x1xf32>
    %188 = arith.addf %184, %187 : vector<16x1xf32>
    %189 = math.rsqrt %188 : vector<16x1xf32>
    %190 = vector.broadcast %189 : vector<16x1xf32> to vector<16x32xf32>
    %191 = arith.mulf %186, %190 : vector<16x32xf32>
    %192 = vector.broadcast %143 : vector<1x32xf32> to vector<16x32xf32>
    %193 = arith.mulf %191, %192 : vector<16x32xf32>
    %194 = vector.broadcast %144 : vector<1x32xf32> to vector<16x32xf32>
    %195 = arith.addf %193, %194 : vector<16x32xf32>
    %cst_76 = arith.constant dense<0.000000e+00> : vector<16x64xf32>
    %196 = tpu.matmul %195, %137, %cst_76 {dimension_numbers = #tpu.dot_dimension_numbers<[1], [0], [0], [1], [0, 0, 1, 1], [], []>} : vector<16x32xf32>, vector<32x64xf32>, vector<16x64xf32> -> vector<16x64xf32>
    %197 = vector.broadcast %141 : vector<1x64xf32> to vector<16x64xf32>
    %198 = arith.addf %196, %197 : vector<16x64xf32>
    %199 = arith.mulf %198, %198 : vector<16x64xf32>
    %200 = arith.mulf %198, %199 : vector<16x64xf32>
    %cst_77 = arith.constant 4.471500e-02 : f32
    %201 = vector.broadcast %cst_77 : f32 to vector<16x64xf32>
    %202 = arith.mulf %201, %200 : vector<16x64xf32>
    %203 = arith.addf %198, %202 : vector<16x64xf32>
    %cst_78 = arith.constant 0.797884583 : f32
    %204 = vector.broadcast %cst_78 : f32 to vector<16x64xf32>
    %205 = arith.mulf %204, %203 : vector<16x64xf32>
    %206 = math.tanh %205 : vector<16x64xf32>
    %cst_79 = arith.constant 1.000000e+00 : f32
    %207 = vector.broadcast %cst_79 : f32 to vector<16x64xf32>
    %208 = arith.addf %207, %206 : vector<16x64xf32>
    %cst_80 = arith.constant 5.000000e-01 : f32
    %209 = vector.broadcast %cst_80 : f32 to vector<16x64xf32>
    %210 = arith.mulf %209, %208 : vector<16x64xf32>
    %211 = arith.mulf %198, %210 : vector<16x64xf32>
    %cst_81 = arith.constant dense<0.000000e+00> : vector<16x32xf32>
    %212 = tpu.matmul %211, %138, %cst_81 {dimension_numbers = #tpu.dot_dimension_numbers<[1], [0], [0], [1], [0, 0, 1, 1], [], []>} : vector<16x64xf32>, vector<64x32xf32>, vector<16x32xf32> -> vector<16x32xf32>
    %213 = vector.broadcast %142 : vector<1x32xf32> to vector<16x32xf32>
    %214 = arith.addf %212, %213 : vector<16x32xf32>
    %215 = arith.addf %195, %214 : vector<16x32xf32>
    %cst_82 = arith.constant dense<0.000000e+00> : vector<16xf32>
    %216 = vector.multi_reduction <add>, %215, %cst_82 [1] : vector<16x32xf32> to vector<16xf32>
    %217 = vector.shape_cast %216 : vector<16xf32> to vector<16x1xf32>
    %cst_83 = arith.constant 3.200000e+01 : f32
    %218 = vector.broadcast %cst_83 : f32 to vector<16x1xf32>
    %219 = arith.divf %217, %218 : vector<16x1xf32>
    %220 = vector.broadcast %219 : vector<16x1xf32> to vector<16x32xf32>
    %221 = arith.subf %215, %220 : vector<16x32xf32>
    %222 = arith.mulf %221, %221 : vector<16x32xf32>
    %cst_84 = arith.constant dense<0.000000e+00> : vector<16xf32>
    %223 = vector.multi_reduction <add>, %222, %cst_84 [1] : vector<16x32xf32> to vector<16xf32>
    %224 = vector.shape_cast %223 : vector<16xf32> to vector<16x1xf32>
    %cst_85 = arith.constant 3.200000e+01 : f32
    %225 = vector.broadcast %cst_85 : f32 to vector<16x1xf32>
    %226 = arith.divf %224, %225 : vector<16x1xf32>
    %227 = vector.broadcast %219 : vector<16x1xf32> to vector<16x32xf32>
    %228 = arith.subf %215, %227 : vector<16x32xf32>
    %cst_86 = arith.constant 9.99999996E-13 : f32
    %229 = vector.broadcast %cst_86 : f32 to vector<16x1xf32>
    %230 = arith.addf %226, %229 : vector<16x1xf32>
    %231 = math.rsqrt %230 : vector<16x1xf32>
    %232 = vector.broadcast %231 : vector<16x1xf32> to vector<16x32xf32>
    %233 = arith.mulf %228, %232 : vector<16x32xf32>
    %234 = vector.broadcast %145 : vector<1x32xf32> to vector<16x32xf32>
    %235 = arith.mulf %233, %234 : vector<16x32xf32>
    %236 = vector.broadcast %146 : vector<1x32xf32> to vector<16x32xf32>
    %237 = arith.addf %235, %236 : vector<16x32xf32>
    %cst_87 = arith.constant dense<0.000000e+00> : vector<2x32xf32>
    %238 = tpu.matmul %5, %237, %cst_87 {dimension_numbers = #tpu.dot_dimension_numbers<[1], [0], [0], [1], [0, 0, 1, 1], [], []>} : vector<2x16xf32>, vector<16x32xf32>, vector<2x32xf32> -> vector<2x32xf32>
    %239 = vector.broadcast %8 : vector<1x32xf32> to vector<2x32xf32>
    %240 = arith.mulf %238, %239 : vector<2x32xf32>
    %cst_88 = arith.constant dense<0.000000e+00> : vector<2xf32>
    %241 = vector.multi_reduction <add>, %240, %cst_88 [1] : vector<2x32xf32> to vector<2xf32>
    %242 = vector.shape_cast %241 : vector<2xf32> to vector<2x1xf32>
    %243 = vector.broadcast %9 : vector<1x1xf32> to vector<2x1xf32>
    %244 = arith.addf %242, %243 : vector<2x1xf32>
    %c0_89 = arith.constant 0 : index
    %c0_90 = arith.constant 0 : index
    %245 = vector.load %arg3[%c0_89, %c0_90] : memref<2x1xf32, #tpu.memory_space<vmem>>, vector<2x1xf32>
    tpu.vector_store %arg3[%c0_89, %c0_90], %244 {strides = array<i32>} : memref<2x1xf32, #tpu.memory_space<vmem>>, vector<2x1xf32>,
    return
  }
  func.func @transform_0(%arg0: i32) -> (i32, i32) {
    %c0_i32 = arith.constant 0 : i32
    %c0_i32_0 = arith.constant 0 : i32
    %c0_i32_1 = arith.constant 0 : i32
    return %c0_i32, %c0_i32_0 : i32, i32
  }
  func.func @transform_1(%arg0: i32) -> (i32, i32) {
    %c0_i32 = arith.constant 0 : i32
    %c0_i32_0 = arith.constant 0 : i32
    %c0_i32_1 = arith.constant 0 : i32
    return %c0_i32, %c0_i32_0 : i32, i32
  }
  func.func @transform_2(%arg0: i32) -> (i32, i32) {
    %c0_i32 = arith.constant 0 : i32
    %c0_i32_0 = arith.constant 0 : i32
    %c0_i32_1 = arith.constant 0 : i32
    return %c0_i32, %c0_i32_0 : i32, i32
  }
}

</mosaic_0001>

<bundles_post_ra>
// kernel: bert_sentence_classifier.1
= control target key start
LH: loop header
LB: loop body
LE: loop exit
PB: predicated region body
PF: predicated region fallthrough
CT: control target
= control target key end

     0   :  { %vm44_vm0 = vcmask 261120   ;;  %vm205_vm1 = vcmask 130048   ;;  %s2576_s29 = smov 96   ;;  %vm486_vm2 = vcmask 523264   ;;  %s2577_s14 = smov 32   ;;  %vm2579_vm3 = vmmov 0   ;;  %s3210_s0 = inlined_call_operand.vmem [shape: f32[32,128], index: 0, kind: input, shape index: {}]   ;;  %s3211_s1 = inlined_call_operand.vmem [shape: f32[552,128], index: 1, kind: input, shape index: {}]   ;;  %s3212_s2 = inlined_call_operand.vmem [shape: f32[2,1], index: 2, kind: output, shape index: {}]  }
   0x1   :  { %v11_v0 = vld [vmem:[%s3210_s0] sm:$0xff]  ;;  %v12_v1 = vld [vmem:[%s3210_s0 + $0x8] sm:$0xff]  ;;  %v87_v14 = vld [vmem:[%s3211_s1 + $0xf0] sm:$0xff]  ;;  %vm2036_vm4 = vcmask 254976   ;;  %vm2045_vm5 = vcmask 1024  }
   0x2   :  { %v45_v2 = vsel %vm44_vm0, %v11_v0, 0.0  ;;  %v48_v3 = vsel %vm44_vm0, %v12_v1, 0.0  ;;  %v86_v15 = vld [vmem:[%s3211_s1 + $0xe8] sm:$0xff]  ;;  %2271 = vmatprep.subr.mxu1 %v87_v14  ;;  %v85_v16 = vld [vmem:[%s3211_s1 + $0xe0] sm:$0xff]  ;;  %v84_v17 = vld [vmem:[%s3211_s1 + $0xd8] sm:$0xff] }
   0x3   :  { %46 = vadd.xlane.f32.xlu0 %v45_v2  ;;  %2272 = vmatpush3.msra.mxu1 %v87_v14  ;;  %v2051_v25 = vld [vmem:[%s3211_s1 + $0xc8] ss:$0 sm:$0xff]  ;;  %v2052_v27 = vld [vmem:[%s3211_s1 + $0xc9] ss:$0 sm:$0xff]  ;;  %v2634_v34 = vld [vmem:[%s3211_s1] sm:$0xff] }
   0x4   :  { %2273 = vmatprep.subr.mxu1 %v86_v15  ;;  %v2053_v35 = vld [vmem:[%s3211_s1 + $0x178] ss:$0 sm:$0xff]  ;;  %v2649_v42 = vld [vmem:[%s3211_s1 + $0x8] sm:$0xff]  ;;  %v2654_v43 = vld [vmem:[%s3211_s1 + $0x10] sm:$0xff] }
   0x5   :  { %2274 = vmatpush3.msra.mxu1 %v86_v15  ;;  %v2663_v44 = vld [vmem:[%s3211_s1 + $0x18] sm:$0xff]  ;;  %v2668_v45 = vld [vmem:[%s3211_s1 + $0x20] sm:$0xff]  ;;  %v2677_v46 = vld [vmem:[%s3211_s1 + $0x28] sm:$0xff] }
   0x6   :  { %2275 = vmatprep.subr.mxu1 %v85_v16  ;;  %v2682_v47 = vld [vmem:[%s3211_s1 + $0x30] sm:$0xff]  ;;  %v2691_v48 = vld [vmem:[%s3211_s1 + $0x38] sm:$0xff]  ;;  %v2730_v61 = vld [vmem:[%s3211_s1 + $0x68] sm:$0xff] }
   0x7   :  { %49 = vadd.xlane.f32.xlu0 %v48_v3  ;;  %2276 = vmatpush3.msra.mxu1 %v85_v16  ;;  %v2711_v55 = vld [vmem:[%s3211_s1 + $0x78] sm:$0xff]  ;;  %v2718_v57 = vld [vmem:[%s3211_s1 + $0x70] sm:$0xff]  ;;  %v2739_v63 = vld [vmem:[%s3211_s1 + $0x60] sm:$0xff] }
   0x8   :  { %2277 = vmatprep.subr.mxu1 %v84_v17  ;;  %v2757_v3 = vld [vmem:[%s3211_s1 + $0x50] sm:$0xff] }
   0x9   :  { %2278 = vmatpush3.msra.mxu1 %v84_v17  ;;  %v2803_v17 = vld [vmem:[%s3211_s1 + $0xb8] sm:$0xff] }
   0xa   :  { %2317 = vmatprep.subr.mxu0 %v2803_v17 }
   0xb   :  { %2318 = vmatpush3.msra.mxu0 %v2803_v17 }
  0x8c   :  { %v47_v4 = vpop.xlane.xlu0 %46 }
  0x8d   :  { %v52_v5 = vmul.f32 0.03125, %v47_v4 }
  0x8f   :  { %v54_v6 = vsub.f32 %v11_v0, %v52_v5  ;;  %v2766_v5 = vld [vmem:[%s3211_s1 + $0x48] sm:$0xff] }
  0x90   :  { %v50_v7 = vpop.xlane.xlu0 %49 }
  0x91   :  { %v53_v8 = vmul.f32 0.03125, %v50_v7  ;;  %v56_v9 = vmul.f32 %v54_v6, %v54_v6  ;;  %v2775_v7 = vld [vmem:[%s3211_s1 + $0x40] sm:$0xff] }
  0x93   :  { %v55_v10 = vsub.f32 %v12_v1, %v53_v8  ;;  %v58_v11 = vsel %vm44_vm0, %v56_v9, 0.0  ;;  %v2748_v1 = vld [vmem:[%s3211_s1 + $0x58] sm:$0xff] }
  0x94   :  { %59 = vadd.xlane.f32.xlu1 %v58_v11  ;;  %v2789_v9 = vld [vmem:[%s3210_s0 + $0x18] sm:$0xff]  ;;  %v2794_v11 = vld [vmem:[%s3210_s0 + $0x10] sm:$0xff] }
  0x95   :  { %v57_v12 = vmul.f32 %v55_v10, %v55_v10 }
  0x97   :  { %v61_v13 = vsel %vm44_vm0, %v57_v12, 0.0 }
  0x98   :  { %62 = vadd.xlane.f32.xlu1 %v61_v13 }
 0x11d   :  { %v60_v18 = vpop.xlane.xlu1 %59 }
 0x11e   :  { %v64_v19 = vmul.f32 0.03125, %v60_v18  ;;  %v2810_v18 = vld [vmem:[%s3211_s1 + $0xb0] sm:$0xff] }
 0x11f   :  { %2319 = vmatprep.subr.mxu0 %v2810_v18 }
 0x120   :  { %v66_v20 = vadd.f32 1e-12, %v64_v19  ;;  %2320 = vmatpush3.msra.mxu0 %v2810_v18  ;;  %v2817_v19 = vld [vmem:[%s3211_s1 + $0xa8] sm:$0xff] }
 0x121   :  { %v63_v21 = vpop.xlane.xlu1 %62  ;;  %2321 = vmatprep.subr.mxu0 %v2817_v19 }
 0x122   :  { %2532 = vrsqrt.f32 %v66_v20  ;;  %v65_v22 = vmul.f32 0.03125, %v63_v21  ;;  %2322 = vmatpush3.msra.mxu0 %v2817_v19  ;;  %v2825_v20 = vld [vmem:[%s3211_s1 + $0xa0] sm:$0xff]  ;;  %v2833_v21 = vld [vmem:[%s3211_s1 + $0x98] sm:$0xff] }
 0x123   :  { %2323 = vmatprep.subr.mxu0 %v2825_v20 }
 0x124   :  { %v67_v23 = vadd.f32 1e-12, %v65_v22  ;;  %2324 = vmatpush3.msra.mxu0 %v2825_v20  ;;  %v2841_v22 = vld [vmem:[%s3211_s1 + $0x90] sm:$0xff] }
 0x125   :  { %2325 = vmatprep.subr.mxu0 %v2833_v21 }
 0x126   :  { %2534 = vrsqrt.f32 %v67_v23  ;;  %2326 = vmatpush3.msra.mxu0 %v2833_v21  ;;  %v2849_v23 = vld [vmem:[%s3211_s1 + $0x88] sm:$0xff] }
 0x127   :  { %2327 = vmatprep.subr.mxu0 %v2841_v22 }
 0x128   :  { %2328 = vmatpush3.msra.mxu0 %v2841_v22 }
 0x129   :  { %2329 = vmatprep.subr.mxu0 %v2849_v23 }
 0x12a   :  { %2330 = vmatpush3.msra.mxu0 %v2849_v23 }
 0x12f   :  { %v2533_v24 = vpop.eup %2532 }
 0x130   :  { %v70_v26 = vmul.f32 %v2533_v24, %v54_v6  ;;  %v2857_v24 = vld [vmem:[%s3211_s1 + $0x80] sm:$0xff] }
 0x131   :  { %2331 = vmatprep.subr.mxu0 %v2857_v24 }
 0x132   :  { %v76_v28 = vmul.f32 %v2051_v25, %v70_v26  ;;  %2332 = vmatpush3.msra.mxu0 %v2857_v24 }
 0x133   :  { %v2535_v29 = vpop.eup %2534 }
 0x134   :  { %v71_v30 = vmul.f32 %v2535_v29, %v55_v10  ;;  %v2623_v31 = vadd.f32 %v2052_v27, %v76_v28 }
 0x136   :  { %v77_v32 = vmul.f32 %v2051_v25, %v71_v30  ;;  %2279 = vmatprep.mubr.msk.f32.mxu1 %vm44_vm0, %v2623_v31 }
 0x138   :  { %v2627_v33 = vadd.f32 %v2052_v27, %v77_v32 }
 0x13a   :  { %2280 = vmatmul.mubr.msk.f32.vlgmr.msra.gmra.mxu1 %vm44_vm0, %v2627_v33 }
 0x13b   :  { %2286 = vmatprep.mubr.msk.f32.mxu1 %vm205_vm1, %v2634_v34 }
 0x1fa   :  { %v2281_v36 = vpop.f32.mrf.mxu1 }
 0x1fb   :  { %v2641_v37 = vadd.f32 %v2281_v36, %v2053_v35 }
 0x1fc   :  { %v188_v38 = vpop.f32.mrf.mxu1 }
 0x1fd   :  { %v189_v39 = vadd.f32 %v2053_v35, %v188_v38  ;;  %201 = vrot.lane.b32.xlu0 %v2641_v37, %s2576_s29 }
 0x1ff   :  { %199 = vrot.lane.b32.xlu1 %v189_v39, %s2576_s29 }
 0x26f   :  { %v202_v40 = vpop.permute.xlu0 %201 }
 0x270   :  { %2282 = vmatprep.subr.mxu1 %v202_v40 }
 0x271   :  { %2283 = vmatpush3.msra.mxu1 %v202_v40  ;;  %v200_v41 = vpop.permute.xlu1 %199 }
 0x272   :  { %2284 = vmatprep.subr.mxu1 %v200_v41 }
 0x273   :  { %2285 = vmatpush3.msra.mxu1 %v200_v41 }
 0x274   :  { %2287 = vmatmul.mubr.msk.f32.vlgmr.msra.gmra.mxu1 %vm205_vm1, %v2649_v42 }
 0x275   :  { %2289 = vmatprep.mubr.msk.f32.mxu1 %vm205_vm1, %v2654_v43 }
 0x278   :  { %2290 = vmatmul.mubr.msk.f32.gmra.mxu1 %vm205_vm1, %v2663_v44 }
 0x279   :  { %2292 = vmatprep.mubr.msk.f32.mxu1 %vm205_vm1, %v2668_v45 }
 0x27c   :  { %2293 = vmatmul.mubr.msk.f32.gmra.mxu1 %vm205_vm1, %v2677_v46 }
 0x27d   :  { %2295 = vmatprep.mubr.msk.f32.mxu1 %vm205_vm1, %v2682_v47 }
 0x280   :  { %2296 = vmatmul.mubr.msk.f32.gmra.mxu1 %vm205_vm1, %v2691_v48 }
 0x281   :  { %2314 = vmatprep.mubr.msk.f32.mxu1 %vm44_vm0, %v189_v39 }
 0x334   :  { %v2696_v49 = vpop.f32.mrf.mxu1 }
 0x335   :  { %v336_v6 = vmul.f32 %v2696_v49, %v2766_v5 }
 0x336   :  { %v2698_v50 = vpop.f32.mrf.mxu1 }
 0x337   :  { %v335_v8 = vmul.f32 %v2698_v50, %v2775_v7 }
 0x338   :  { %v2700_v51 = vpop.f32.mrf.mxu1 }
 0x339   :  { %v338_v2 = vmul.f32 %v2700_v51, %v2748_v1 }
 0x33a   :  { %v2702_v52 = vpop.f32.mrf.mxu1 }
 0x33b   :  { %v337_v4 = vmul.f32 %v2702_v52, %v2757_v3 }
 0x33c   :  { %v2704_v53 = vpop.f32.mrf.mxu1 }
 0x33d   :  { %v340_v62 = vmul.f32 %v2704_v53, %v2730_v61 }
 0x33e   :  { %v2706_v54 = vpop.f32.mrf.mxu1 }
 0x33f   :  { %v339_v0 = vmul.f32 %v2706_v54, %v2739_v63 }
 0x340   :  { %v2713_v56 = vpop.f32.mrf.mxu1 }
 0x341   :  { %v342_v58 = vmul.f32 %v2713_v56, %v2711_v55 }
 0x342   :  { %v2722_v59 = vpop.f32.mrf.mxu1 }
 0x343   :  { %v341_v60 = vmul.f32 %v2722_v59, %v2718_v57  ;;  %2298 = vmatprep.subr.msk.mxu1 %vm44_vm0, %v342_v58 }
 0x344   :  { %2299 = vmatpush3.xpose.msk.msra.mxu1 %vm44_vm0, %v342_v58 }
 0x345   :  { %2300 = vmatprep.subr.msk.mxu1 %vm44_vm0, %v341_v60 }
 0x348   :  { %2301 = vmatpush3.xpose.msk.msra.mxu1 %vm44_vm0, %v341_v60 }
 0x349   :  { %2302 = vmatprep.subr.msk.mxu1 %vm44_vm0, %v340_v62 }
 0x34c   :  { %2303 = vmatpush3.xpose.msk.msra.mxu1 %vm44_vm0, %v340_v62 }
 0x34d   :  { %2304 = vmatprep.subr.msk.mxu1 %vm44_vm0, %v339_v0 }
 0x350   :  { %2305 = vmatpush3.xpose.msk.msra.mxu1 %vm44_vm0, %v339_v0 }
 0x351   :  { %2306 = vmatprep.subr.msk.mxu1 %vm44_vm0, %v338_v2 }
 0x354   :  { %2307 = vmatpush3.xpose.msk.msra.mxu1 %vm44_vm0, %v338_v2 }
 0x355   :  { %2308 = vmatprep.subr.msk.mxu1 %vm44_vm0, %v337_v4 }
 0x358   :  { %2309 = vmatpush3.xpose.msk.msra.mxu1 %vm44_vm0, %v337_v4 }
 0x359   :  { %2310 = vmatprep.subr.msk.mxu1 %vm44_vm0, %v336_v6 }
 0x35c   :  { %2311 = vmatpush3.xpose.msk.msra.mxu1 %vm44_vm0, %v336_v6 }
 0x35d   :  { %2312 = vmatprep.subr.msk.mxu1 %vm44_vm0, %v335_v8 }
 0x360   :  { %2313 = vmatpush3.xpose.msk.msra.mxu1 %vm44_vm0, %v335_v8 }
 0x363   :  { %2315 = vmatmul.mubr.msk.f32.vlgmr.msra.gmra.mxu1 %vm44_vm0, %v2641_v37 }
 0x423   :  { %v2316_v10 = vpop.f32.mrf.mxu1 }
 0x424   :  { %v483_v12 = vadd.f32 %v2316_v10, %v2789_v9 }
 0x425   :  { %v477_v13 = vpop.f32.mrf.mxu1 }
 0x426   :  { %v478_v14 = vadd.f32 %v477_v13, %v2794_v11  ;;  %v490_v15 = vsel %vm486_vm2, %v483_v12, -inf }
 0x427   :  { %491 = vmax.xlane.f32.xlu0 %v490_v15 }
 0x428   :  { %v487_v16 = vsel %vm486_vm2, %v478_v14, -inf }
 0x429   :  { %488 = vmax.xlane.f32.xlu1 %v487_v16 }
 0x43a   :  { %363 = vrot.lane.b32.xlu1 %v2718_v57, %s2577_s14 }
 0x43d   :  { %365 = vrot.lane.b32.xlu0 %v2711_v55, %s2577_s14 }
 0x43e   :  { %361 = vrot.lane.b32.xlu1 %v2730_v61, %s2577_s14 }
 0x441   :  { %357 = vrot.lane.b32.xlu0 %v2748_v1, %s2577_s14 }
 0x442   :  { %359 = vrot.lane.b32.xlu1 %v2739_v63, %s2577_s14 }
 0x445   :  { %353 = vrot.lane.b32.xlu0 %v2766_v5, %s2577_s14 }
 0x446   :  { %355 = vrot.lane.b32.xlu1 %v2757_v3, %s2577_s14 }
 0x44a   :  { %351 = vrot.lane.b32.xlu1 %v2775_v7, %s2577_s14 }
 0x4b0   :  { %v492_v25 = vpop.xlane.xlu0 %491 }
 0x4b1   :  { %v494_v26 = vsub.f32 %v483_v12, %v492_v25 }
 0x4b2   :  { %v489_v27 = vpop.xlane.xlu1 %488 }
 0x4b3   :  { %v493_v28 = vsub.f32 %v478_v14, %v489_v27  ;;  %v497_v29 = vmul.f32 1.442695, %v494_v26 }
 0x4b4   :  { %v2864_v30 = vpop.permute.xlu0 %365 }
 0x4b5   :  { %v495_v32 = vmul.f32 1.442695, %v493_v28  ;;  %v382_v35 = vmul.f32 %v2713_v56, %v2864_v30 }
 0x4b6   :  { %v2868_v36 = vpop.permute.xlu1 %363 }
 0x4b7   :  { %2536 = vpow2.f32 %v495_v32  ;;  %v381_v37 = vmul.f32 %v2868_v36, %v2722_v59  ;;  %606 = vrot.lane.b32.xlu0 %v382_v35, %s2576_s29  ;;  %v89_v35 = vld [vmem:[%s3211_s1 + $0x100] sm:$0xff] }
 0x4b8   :  { %2538 = vpow2.f32 %v497_v29  ;;  %v2874_v38 = vpop.permute.xlu0 %357 }
 0x4b9   :  { %604 = vrot.lane.b32.xlu1 %v381_v37, %s2576_s29  ;;  %v378_v56 = vmul.f32 %v2700_v51, %v2874_v38  ;;  %v88_v37 = vld [vmem:[%s3211_s1 + $0xf8] sm:$0xff] }
 0x4ba   :  { %v2876_v39 = vpop.permute.xlu1 %361 }
 0x4bb   :  { %v380_v40 = vmul.f32 %v2704_v53, %v2876_v39 }
 0x4bc   :  { %v2887_v59 = vpop.permute.xlu0 %353 }
 0x4bd   :  { %602 = vrot.lane.b32.xlu0 %v380_v40, %s2576_s29  ;;  %v376_v53 = vmul.f32 %v2696_v49, %v2887_v59  ;;  %v91_v49 = vld [vmem:[%s3211_s1 + $0x110] sm:$0xff] }
 0x4be   :  { %v2881_v41 = vpop.permute.xlu1 %359  ;;  %2355 = vmatprep.subr.mxu1 %v91_v49 }
 0x4bf   :  { %v379_v58 = vmul.f32 %v2881_v41, %v2706_v54  ;;  %2356 = vmatpush3.msra.mxu1 %v91_v49 }
 0x4c1   :  { %598 = vrot.lane.b32.xlu0 %v378_v56, %s2576_s29  ;;  %600 = vrot.lane.b32.xlu1 %v379_v58, %s2576_s29  ;;  %v2078_v58 = vld [vmem:[%s3211_s1 + $0x179] ss:$0 sm:$0xff] }
 0x4c2   :  { %v2891_v60 = vpop.permute.xlu1 %355 }
 0x4c3   :  { %v377_v62 = vmul.f32 %v2891_v60, %v2702_v52  ;;  %v90_v52 = vld [vmem:[%s3211_s1 + $0x108] sm:$0xff] }
 0x4c4   :  { %v2537_v0 = vpop.eup %2536  ;;  %2357 = vmatprep.subr.mxu1 %v90_v52 }
 0x4c5   :  { %v2539_v2 = vpop.eup %2538  ;;  %2333 = vmatprep.mubr.msk.f32.mxu0 %vm486_vm2, %v2537_v0  ;;  %594 = vrot.lane.b32.xlu0 %v376_v53, %s2576_s29 }
 0x4c6   :  { %596 = vrot.lane.b32.xlu1 %v377_v62, %s2576_s29  ;;  %2334 = vmatmul.mubr.msk.f32.vlgmr.msra.gmra.mxu0 %vm486_vm2, %v2539_v2  ;;  %v2901_v51 = vpop.permute.xlu1 %351 }
 0x4c7   :  { %v375_v54 = vmul.f32 %v2901_v51, %v2698_v50  ;;  %2358 = vmatpush3.msra.mxu1 %v90_v52 }
 0x4c8   :  { %2359 = vmatprep.subr.mxu1 %v89_v35 }
 0x4c9   :  { %2360 = vmatpush3.msra.mxu1 %v89_v35 }
 0x4ca   :  { %592 = vrot.lane.b32.xlu1 %v375_v54, %s2576_s29  ;;  %2361 = vmatprep.subr.mxu1 %v88_v37 }
 0x4cb   :  { %2362 = vmatpush3.msra.mxu1 %v88_v37 }
 0x529   :  { %v607_v4 = vpop.permute.xlu0 %606 }
 0x52a   :  { %2336 = vmatprep.subr.mxu0 %v607_v4 }
 0x52b   :  { %2337 = vmatpush3.msra.mxu0 %v607_v4  ;;  %v605_v6 = vpop.permute.xlu1 %604 }
 0x52c   :  { %2338 = vmatprep.subr.mxu0 %v605_v6 }
 0x52d   :  { %2339 = vmatpush3.msra.mxu0 %v605_v6 }
 0x52f   :  { %v603_v50 = vpop.permute.xlu0 %602 }
 0x530   :  { %2340 = vmatprep.subr.mxu0 %v603_v50 }
 0x531   :  { %2341 = vmatpush3.msra.mxu0 %v603_v50 }
 0x533   :  { %v601_v8 = vpop.permute.xlu1 %600  ;;  %v599_v10 = vpop.permute.xlu0 %598 }
 0x534   :  { %2342 = vmatprep.subr.mxu0 %v601_v8 }
 0x535   :  { %2343 = vmatpush3.msra.mxu0 %v601_v8 }
 0x536   :  { %2344 = vmatprep.subr.mxu0 %v599_v10 }
 0x537   :  { %2345 = vmatpush3.msra.mxu0 %v599_v10  ;;  %v595_v13 = vpop.permute.xlu0 %594 }
 0x538   :  { %v597_v12 = vpop.permute.xlu1 %596 }
 0x539   :  { %2346 = vmatprep.subr.mxu0 %v597_v12 }
 0x53a   :  { %2347 = vmatpush3.msra.mxu0 %v597_v12 }
 0x53b   :  { %2348 = vmatprep.subr.mxu0 %v595_v13 }
 0x53c   :  { %2349 = vmatpush3.msra.mxu0 %v595_v13  ;;  %v593_v14 = vpop.permute.xlu1 %592 }
 0x53d   :  { %2350 = vmatprep.subr.mxu0 %v593_v14 }
 0x53e   :  { %2351 = vmatpush3.msra.mxu0 %v593_v14 }
 0x586   :  { %v2335_v15 = vpop.f32.mrf.mxu0 }
 0x587   :  { %v577_v16 = vadd.f32 1e-20, %v2335_v15 }
 0x588   :  { %v571_v25 = vpop.f32.mrf.mxu0 }
 0x589   :  { %v572_v26 = vadd.f32 1e-20, %v571_v25  ;;  %2540 = vrcp.f32 %v577_v16  ;;  %v94_v25 = vld [vmem:[%s3211_s1 + $0x128] sm:$0xff] }
 0x58b   :  { %2542 = vrcp.f32 %v572_v26  ;;  %v93_v26 = vld [vmem:[%s3211_s1 + $0x120] sm:$0xff] }
 0x596   :  { %v2541_v27 = vpop.eup %2540 }
 0x597   :  { %v583_v32 = vmul.f32 %v2541_v27, %v2539_v2  ;;  %v92_v27 = vld [vmem:[%s3211_s1 + $0x118] sm:$0xff] }
 0x598   :  { %v2543_v28 = vpop.eup %2542 }
 0x599   :  { %v582_v29 = vmul.f32 %v2543_v28, %v2537_v0 }
 0x59b   :  { %2352 = vmatprep.mubr.msk.f32.mxu0 %vm486_vm2, %v582_v29 }
 0x59c   :  { %2353 = vmatmul.mubr.msk.f32.vlgmr.msra.gmra.mxu0 %vm486_vm2, %v583_v32 }
 0x65c   :  { %v2354_v40 = vpop.f32.mrf.mxu0 }
 0x65e   :  { %v688_v56 = vpop.f32.mrf.mxu0 }
 0x65f   :  { %2363 = vmatprep.mubr.msk.f32.mxu1 %vm44_vm0, %v688_v56 }
 0x660   :  { %2364 = vmatmul.mubr.msk.f32.vlgmr.msra.gmra.mxu1 %vm44_vm0, %v2354_v40 }
 0x720   :  { %v2365_v53 = vpop.f32.mrf.mxu1 }
 0x721   :  { %v779_v62 = vadd.f32 %v2365_v53, %v2078_v58 }
 0x722   :  { %v773_v0 = vpop.f32.mrf.mxu1 }
 0x723   :  { %v774_v2 = vadd.f32 %v2078_v58, %v773_v0  ;;  %v783_v54 = vadd.f32 %v779_v62, %v2627_v33  ;;  %v2081_v58 = vld [vmem:[%s3211_s1 + $0x17c] ss:$0 sm:$0xff]  ;;  %v2082_v62 = vld [vmem:[%s3211_s1 + $0x17d] ss:$0 sm:$0xff] }
 0x725   :  { %v787_v49 = vsel %vm44_vm0, %v783_v54, 0.0  ;;  %v782_v52 = vadd.f32 %v774_v2, %v2623_v31  ;;  %v95_v31 = vld [vmem:[%s3211_s1 + $0x130] sm:$0xff] }
 0x726   :  { %788 = vadd.xlane.f32.xlu1 %v787_v49  ;;  %2366 = vmatprep.subr.mxu0 %v95_v31 }
 0x727   :  { %v784_v4 = vsel %vm44_vm0, %v782_v52, 0.0  ;;  %2367 = vmatpush3.msra.mxu0 %v95_v31 }
 0x728   :  { %785 = vadd.xlane.f32.xlu0 %v784_v4  ;;  %2368 = vmatprep.subr.mxu0 %v94_v25 }
 0x729   :  { %2369 = vmatpush3.msra.mxu0 %v94_v25 }
 0x72a   :  { %2370 = vmatprep.subr.mxu0 %v93_v26 }
 0x72b   :  { %2371 = vmatpush3.msra.mxu0 %v93_v26 }
 0x72c   :  { %2372 = vmatprep.subr.mxu0 %v92_v27 }
 0x72d   :  { %2373 = vmatpush3.msra.mxu0 %v92_v27 }
 0x7af   :  { %v789_v6 = vpop.xlane.xlu1 %788 }
 0x7b0   :  { %v791_v50 = vmul.f32 0.03125, %v789_v6  ;;  %v103_v6 = vld [vmem:[%s3211_s1 + $0x170] sm:$0xff] }
 0x7b1   :  { %v786_v8 = vpop.xlane.xlu0 %785  ;;  %2377 = vmatprep.subr.mxu1 %v103_v6 }
 0x7b2   :  { %v790_v10 = vmul.f32 0.03125, %v786_v8  ;;  %v793_v12 = vsub.f32 %v783_v54, %v791_v50  ;;  %2378 = vmatpush3.msra.mxu1 %v103_v6  ;;  %v102_v50 = vld [vmem:[%s3211_s1 + $0x168] sm:$0xff]  ;;  %v101_v8 = vld [vmem:[%s3211_s1 + $0x160] sm:$0xff] }
 0x7b3   :  { %2379 = vmatprep.subr.mxu1 %v102_v50 }
 0x7b4   :  { %v792_v13 = vsub.f32 %v782_v52, %v790_v10  ;;  %v795_v16 = vmul.f32 %v793_v12, %v793_v12  ;;  %2380 = vmatpush3.msra.mxu1 %v102_v50  ;;  %v100_v10 = vld [vmem:[%s3211_s1 + $0x158] sm:$0xff] }
 0x7b5   :  { %2381 = vmatprep.subr.mxu1 %v101_v8 }
 0x7b6   :  { %v794_v14 = vmul.f32 %v792_v13, %v792_v13  ;;  %v799_v33 = vsel %vm44_vm0, %v795_v16, 0.0  ;;  %2382 = vmatpush3.msra.mxu1 %v101_v8  ;;  %v2083_v16 = vld [vmem:[%s3211_s1 + $0x17a] ss:$0 sm:$0xff] }
 0x7b7   :  { %2383 = vmatprep.subr.mxu1 %v100_v10 }
 0x7b8   :  { %v796_v15 = vsel %vm44_vm0, %v794_v14, 0.0  ;;  %2384 = vmatpush3.msra.mxu1 %v100_v10  ;;  %v97_v14 = vld [vmem:[%s3211_s1 + $0x140] sm:$0xff] }
 0x7b9   :  { %797 = vadd.xlane.f32.xlu0 %v796_v15  ;;  %v96_v15 = vld [vmem:[%s3211_s1 + $0x138] sm:$0xff] }
 0x7bd   :  { %800 = vadd.xlane.f32.xlu0 %v799_v33 }
 0x842   :  { %v798_v28 = vpop.xlane.xlu0 %797 }
 0x843   :  { %v802_v29 = vmul.f32 0.03125, %v798_v28 }
 0x845   :  { %v804_v32 = vadd.f32 1e-12, %v802_v29 }
 0x846   :  { %v801_v35 = vpop.xlane.xlu0 %800 }
 0x847   :  { %2544 = vrsqrt.f32 %v804_v32  ;;  %v803_v37 = vmul.f32 0.03125, %v801_v35 }
 0x849   :  { %v805_v40 = vadd.f32 1e-12, %v803_v37 }
 0x84b   :  { %2546 = vrsqrt.f32 %v805_v40 }
 0x854   :  { %v2545_v56 = vpop.eup %2544 }
 0x855   :  { %v808_v53 = vmul.f32 %v2545_v56, %v792_v13  ;;  %v98_v13 = vld [vmem:[%s3211_s1 + $0x148] sm:$0xff] }
 0x857   :  { %v814_v0 = vmul.f32 %v2081_v58, %v808_v53 }
 0x858   :  { %v2547_v2 = vpop.eup %2546 }
 0x859   :  { %v809_v54 = vmul.f32 %v2547_v2, %v793_v12  ;;  %v2949_v49 = vadd.f32 %v2082_v62, %v814_v0  ;;  %v99_v12 = vld [vmem:[%s3211_s1 + $0x150] sm:$0xff] }
 0x85a   :  { %2385 = vmatprep.subr.mxu1 %v99_v12 }
 0x85b   :  { %v815_v52 = vmul.f32 %v2081_v58, %v809_v54  ;;  %2374 = vmatprep.mubr.msk.f32.mxu0 %vm44_vm0, %v2949_v49  ;;  %2386 = vmatpush3.msra.mxu1 %v99_v12 }
 0x85c   :  { %2387 = vmatprep.subr.mxu1 %v98_v13 }
 0x85d   :  { %v2953_v4 = vadd.f32 %v2082_v62, %v815_v52  ;;  %2388 = vmatpush3.msra.mxu1 %v98_v13 }
 0x85e   :  { %2389 = vmatprep.subr.mxu1 %v97_v14 }
 0x85f   :  { %2375 = vmatmul.mubr.msk.f32.vlgmr.msra.gmra.mxu0 %vm44_vm0, %v2953_v4  ;;  %2390 = vmatpush3.msra.mxu1 %v97_v14 }
 0x860   :  { %2391 = vmatprep.subr.mxu1 %v96_v15 }
 0x861   :  { %2392 = vmatpush3.msra.mxu1 %v96_v15 }
 0x862   :  { %2442 = vmatprep.subr.mxu1 %v2803_v17 }
 0x91f   :  { %v2376_v33 = vpop.f32.mrf.mxu0 }
 0x920   :  { %v904_v31 = vadd.f32 %v2376_v33, %v2083_v16 }
 0x921   :  { %v898_v25 = vpop.f32.mrf.mxu0 }
 0x922   :  { %v908_v26 = vmul.f32 %v904_v31, %v904_v31  ;;  %v899_v27 = vadd.f32 %v2083_v16, %v898_v25 }
 0x924   :  { %v910_v28 = vmul.f32 %v908_v26, %v904_v31  ;;  %v907_v29 = vmul.f32 %v899_v27, %v899_v27 }
 0x926   :  { %v912_v32 = vmul.f32 0.044715, %v910_v28  ;;  %v909_v35 = vmul.f32 %v907_v29, %v899_v27  ;;  %v1051_v28 = vld [vmem:[%s3211_s1 + $0x188] sm:$0xff]  ;;  %v1050_v29 = vld [vmem:[%s3211_s1 + $0x180] sm:$0xff] }
 0x928   :  { %v914_v37 = vadd.f32 %v912_v32, %v904_v31  ;;  %v911_v40 = vmul.f32 0.044715, %v909_v35 }
 0x92a   :  { %v916_v56 = vmul.f32 0.7978846, %v914_v37  ;;  %v913_v58 = vadd.f32 %v911_v40, %v899_v27 }
 0x92c   :  { %2548 = vtanh.f32 %v916_v56  ;;  %v915_v53 = vmul.f32 0.7978846, %v913_v58 }
 0x92e   :  { %2550 = vtanh.f32 %v915_v53 }
 0x939   :  { %v2549_v62 = vpop.eup %2548 }
 0x93a   :  { %v920_v0 = vadd.f32 1.0, %v2549_v62  ;;  %v2089_v62 = vld [vmem:[%s3211_s1 + $0x17e] ss:$0 sm:$0xff] }
 0x93b   :  { %v2551_v2 = vpop.eup %2550 }
 0x93c   :  { %v919_v54 = vadd.f32 1.0, %v2551_v2  ;;  %v922_v52 = vmul.f32 0.5, %v920_v0 }
 0x93e   :  { %v921_v6 = vmul.f32 0.5, %v919_v54  ;;  %v924_v8 = vmul.f32 %v922_v52, %v904_v31 }
 0x940   :  { %v923_v50 = vmul.f32 %v921_v6, %v899_v27  ;;  %v1052_v27 = vld [vmem:[%s3211_s1 + $0x190] sm:$0xff]  ;;  %v2090_v6 = vld [vmem:[%s3211_s1 + $0x17f] ss:$0 sm:$0xff] }
 0x942   :  { %2393 = vmatprep.mubr.msk.f32.mxu1 %vm486_vm2, %v923_v50 }
 0x943   :  { %2394 = vmatmul.mubr.msk.f32.vlgmr.msra.gmra.mxu1 %vm486_vm2, %v924_v8 }
 0x944   :  { %2443 = vmatpush3.msra.mxu1 %v2803_v17  ;;  %v2086_v17 = vld [vmem:[%s3211_s1 + $0x17b] ss:$0 sm:$0xff] }
 0x945   :  { %2444 = vmatprep.subr.mxu1 %v2810_v18 }
 0x946   :  { %2445 = vmatpush3.msra.mxu1 %v2810_v18 }
 0x947   :  { %2446 = vmatprep.subr.mxu1 %v2817_v19 }
 0x948   :  { %2447 = vmatpush3.msra.mxu1 %v2817_v19 }
 0x949   :  { %2448 = vmatprep.subr.mxu1 %v2825_v20 }
 0x94a   :  { %2449 = vmatpush3.msra.mxu1 %v2825_v20 }
 0x94b   :  { %2450 = vmatprep.subr.mxu1 %v2833_v21 }
 0x94c   :  { %2451 = vmatpush3.msra.mxu1 %v2833_v21 }
 0x94d   :  { %2452 = vmatprep.subr.mxu1 %v2841_v22 }
 0x94e   :  { %2453 = vmatpush3.msra.mxu1 %v2841_v22 }
 0x94f   :  { %2454 = vmatprep.subr.mxu1 %v2849_v23 }
 0x950   :  { %2455 = vmatpush3.msra.mxu1 %v2849_v23 }
 0x951   :  { %2456 = vmatprep.subr.mxu1 %v2857_v24 }
 0x952   :  { %2457 = vmatpush3.msra.mxu1 %v2857_v24 }
 0xa03   :  { %v2395_v18 = vpop.f32.mrf.mxu1 }
 0xa04   :  { %v1007_v19 = vadd.f32 %v2395_v18, %v2086_v17  ;;  %v2091_v18 = vld [vmem:[%s3211_s1 + $0x220] ss:$0 sm:$0xff] }
 0xa05   :  { %v1001_v20 = vpop.f32.mrf.mxu1 }
 0xa06   :  { %v1002_v21 = vadd.f32 %v2086_v17, %v1001_v20  ;;  %v1011_v10 = vadd.f32 %v1007_v19, %v2953_v4 }
 0xa08   :  { %v1015_v22 = vsel %vm44_vm0, %v1011_v10, 0.0  ;;  %v1010_v12 = vadd.f32 %v1002_v21, %v2949_v49  ;;  %v1053_v49 = vld [vmem:[%s3211_s1 + $0x198] sm:$0xff] }
 0xa09   :  { %1016 = vadd.xlane.f32.xlu1 %v1015_v22  ;;  %2396 = vmatprep.subr.mxu0 %v1053_v49 }
 0xa0a   :  { %v1012_v23 = vsel %vm44_vm0, %v1010_v12, 0.0  ;;  %2397 = vmatpush3.msra.mxu0 %v1053_v49 }
 0xa0b   :  { %1013 = vadd.xlane.f32.xlu0 %v1012_v23  ;;  %2398 = vmatprep.subr.mxu0 %v1052_v27 }
 0xa0c   :  { %2399 = vmatpush3.msra.mxu0 %v1052_v27 }
 0xa0d   :  { %2400 = vmatprep.subr.mxu0 %v1051_v28 }
 0xa0e   :  { %2401 = vmatpush3.msra.mxu0 %v1051_v28 }
 0xa0f   :  { %2402 = vmatprep.subr.mxu0 %v1050_v29 }
 0xa10   :  { %2403 = vmatpush3.msra.mxu0 %v1050_v29 }
 0xa92   :  { %v1017_v13 = vpop.xlane.xlu1 %1016 }
 0xa93   :  { %v1019_v24 = vmul.f32 0.03125, %v1017_v13 }
 0xa94   :  { %v1014_v14 = vpop.xlane.xlu0 %1013 }
 0xa95   :  { %v1021_v15 = vsub.f32 %v1011_v10, %v1019_v24  ;;  %v1018_v16 = vmul.f32 0.03125, %v1014_v14 }
 0xa97   :  { %v1020_v33 = vsub.f32 %v1010_v12, %v1018_v16  ;;  %v1023_v31 = vmul.f32 %v1021_v15, %v1021_v15 }
 0xa99   :  { %v1027_v25 = vsel %vm44_vm0, %v1023_v31, 0.0  ;;  %v1022_v26 = vmul.f32 %v1020_v33, %v1020_v33 }
 0xa9a   :  { %1028 = vadd.xlane.f32.xlu1 %v1027_v25 }
 0xa9b   :  { %v1024_v4 = vsel %vm44_vm0, %v1022_v26, 0.0 }
 0xa9c   :  { %1025 = vadd.xlane.f32.xlu0 %v1024_v4 }
 0xb23   :  { %v1029_v32 = vpop.xlane.xlu1 %1028 }
 0xb24   :  { %v1031_v35 = vmul.f32 0.03125, %v1029_v32 }
 0xb25   :  { %v1026_v37 = vpop.xlane.xlu0 %1025 }
 0xb26   :  { %v1033_v40 = vadd.f32 1e-12, %v1031_v35  ;;  %v1030_v56 = vmul.f32 0.03125, %v1026_v37 }
 0xb28   :  { %2552 = vrsqrt.f32 %v1033_v40  ;;  %v1032_v58 = vadd.f32 1e-12, %v1030_v56 }
 0xb2a   :  { %2554 = vrsqrt.f32 %v1032_v58  ;;  %v1057_v58 = vld [vmem:[%s3211_s1 + $0x1b8] sm:$0xff] }
 0xb35   :  { %v2553_v53 = vpop.eup %2552 }
 0xb36   :  { %v1037_v0 = vmul.f32 %v2553_v53, %v1021_v15  ;;  %v1056_v53 = vld [vmem:[%s3211_s1 + $0x1b0] sm:$0xff] }
 0xb37   :  { %v2555_v2 = vpop.eup %2554 }
 0xb38   :  { %v1036_v54 = vmul.f32 %v2555_v2, %v1020_v33  ;;  %v1043_v52 = vmul.f32 %v2089_v62, %v1037_v0 }
 0xb3a   :  { %v1042_v50 = vmul.f32 %v2089_v62, %v1036_v54  ;;  %v3031_v17 = vadd.f32 %v2090_v6, %v1043_v52 }
 0xb3c   :  { %v3029_v8 = vadd.f32 %v2090_v6, %v1042_v50 }
 0xb3e   :  { %2404 = vmatprep.mubr.msk.f32.mxu0 %vm44_vm0, %v3029_v8 }
 0xb3f   :  { %2405 = vmatmul.mubr.msk.f32.vlgmr.msra.gmra.mxu0 %vm44_vm0, %v3031_v17 }
 0xb40   :  { %2411 = vmatprep.mubr.msk.f32.mxu0 %vm205_vm1, %v2634_v34 }
 0xbff   :  { %v2406_v19 = vpop.f32.mrf.mxu0 }
 0xc00   :  { %v1160_v20 = vadd.f32 %v2406_v19, %v2091_v18  ;;  %v1055_v19 = vld [vmem:[%s3211_s1 + $0x1a8] sm:$0xff] }
 0xc01   :  { %v1154_v21 = vpop.f32.mrf.mxu0 }
 0xc02   :  { %v1155_v10 = vadd.f32 %v2091_v18, %v1154_v21  ;;  %1167 = vrot.lane.b32.xlu0 %v1160_v20, %s2576_s29 }
 0xc04   :  { %1165 = vrot.lane.b32.xlu1 %v1155_v10, %s2576_s29 }
 0xc74   :  { %v1168_v22 = vpop.permute.xlu0 %1167 }
 0xc75   :  { %2407 = vmatprep.subr.mxu0 %v1168_v22 }
 0xc76   :  { %2408 = vmatpush3.msra.mxu0 %v1168_v22  ;;  %v1166_v12 = vpop.permute.xlu1 %1165  ;;  %v2116_v22 = vld [vmem:[%s3211_s1 + $0x221] ss:$0 sm:$0xff] }
 0xc77   :  { %2409 = vmatprep.subr.mxu0 %v1166_v12 }
 0xc78   :  { %2410 = vmatpush3.msra.mxu0 %v1166_v12 }
 0xc79   :  { %2412 = vmatmul.mubr.msk.f32.vlgmr.msra.gmra.mxu0 %vm205_vm1, %v2649_v42 }
 0xc7a   :  { %2414 = vmatprep.mubr.msk.f32.mxu0 %vm205_vm1, %v2654_v43 }
 0xc7d   :  { %2415 = vmatmul.mubr.msk.f32.gmra.mxu0 %vm205_vm1, %v2663_v44 }
 0xc7e   :  { %2417 = vmatprep.mubr.msk.f32.mxu0 %vm205_vm1, %v2668_v45 }
 0xc81   :  { %2418 = vmatmul.mubr.msk.f32.gmra.mxu0 %vm205_vm1, %v2677_v46 }
 0xc82   :  { %2420 = vmatprep.mubr.msk.f32.mxu0 %vm205_vm1, %v2682_v47 }
 0xc85   :  { %2421 = vmatmul.mubr.msk.f32.gmra.mxu0 %vm205_vm1, %v2691_v48 }
 0xc86   :  { %2439 = vmatprep.mubr.msk.f32.mxu0 %vm44_vm0, %v1155_v10 }
 0xd39   :  { %v2413_v34 = vpop.f32.mrf.mxu0 }
 0xd3b   :  { %v1237_v42 = vpop.f32.mrf.mxu0 }
 0xd3d   :  { %v2416_v43 = vpop.f32.mrf.mxu0 }
 0xd3f   :  { %v1247_v23 = vpop.f32.mrf.mxu0 }
 0xd40   :  { %v1286_v26 = vmul.f32 %v1247_v23, %v2891_v60 }
 0xd41   :  { %v2419_v13 = vpop.f32.mrf.mxu0 }
 0xd42   :  { %v1281_v47 = vmul.f32 %v2419_v13, %v2730_v61  ;;  %v1277_v61 = vmul.f32 %v2413_v34, %v2766_v5  ;;  %v1289_v25 = vmul.f32 %v2419_v13, %v2876_v39 }
 0xd43   :  { %v1257_v44 = vpop.f32.mrf.mxu0 }
 0xd44   :  { %v1280_v48 = vmul.f32 %v1257_v44, %v2739_v63  ;;  %v1276_v63 = vmul.f32 %v1237_v42, %v2775_v7 }
 0xd45   :  { %v2422_v24 = vpop.f32.mrf.mxu0 }
 0xd46   :  { %v1283_v45 = vmul.f32 %v2422_v24, %v2711_v55  ;;  %v1279_v55 = vmul.f32 %v2416_v43, %v2748_v1  ;;  %v1291_v31 = vmul.f32 %v2422_v24, %v2864_v30  ;;  %v1284_v30 = vmul.f32 %v1237_v42, %v2901_v51 }
 0xd47   :  { %v1267_v14 = vpop.f32.mrf.mxu0 }
 0xd48   :  { %v1282_v46 = vmul.f32 %v1267_v14, %v2718_v57  ;;  %2423 = vmatprep.subr.msk.mxu0 %vm44_vm0, %v1283_v45  ;;  %v1278_v57 = vmul.f32 %v1247_v23, %v2757_v3  ;;  %v1290_v7 = vmul.f32 %v1267_v14, %v2868_v36  ;;  %v1285_v36 = vmul.f32 %v2413_v34, %v2887_v59 }
 0xd49   :  { %2424 = vmatpush3.xpose.msk.msra.mxu0 %vm44_vm0, %v1283_v45 }
 0xd4a   :  { %2425 = vmatprep.subr.msk.mxu0 %vm44_vm0, %v1282_v46 }
 0xd4d   :  { %2426 = vmatpush3.xpose.msk.msra.mxu0 %vm44_vm0, %v1282_v46 }
 0xd4e   :  { %2427 = vmatprep.subr.msk.mxu0 %vm44_vm0, %v1281_v47 }
 0xd51   :  { %2428 = vmatpush3.xpose.msk.msra.mxu0 %vm44_vm0, %v1281_v47 }
 0xd52   :  { %2429 = vmatprep.subr.msk.mxu0 %vm44_vm0, %v1280_v48 }
 0xd55   :  { %2430 = vmatpush3.xpose.msk.msra.mxu0 %vm44_vm0, %v1280_v48 }
 0xd56   :  { %2431 = vmatprep.subr.msk.mxu0 %vm44_vm0, %v1279_v55 }
 0xd59   :  { %2432 = vmatpush3.xpose.msk.msra.mxu0 %vm44_vm0, %v1279_v55 }
 0xd5a   :  { %2433 = vmatprep.subr.msk.mxu0 %vm44_vm0, %v1278_v57 }
 0xd5d   :  { %2434 = vmatpush3.xpose.msk.msra.mxu0 %vm44_vm0, %v1278_v57 }
 0xd5e   :  { %2435 = vmatprep.subr.msk.mxu0 %vm44_vm0, %v1277_v61 }
 0xd61   :  { %2436 = vmatpush3.xpose.msk.msra.mxu0 %vm44_vm0, %v1277_v61 }
 0xd62   :  { %2437 = vmatprep.subr.msk.mxu0 %vm44_vm0, %v1276_v63 }
 0xd65   :  { %2438 = vmatpush3.xpose.msk.msra.mxu0 %vm44_vm0, %v1276_v63 }
 0xd66   :  { %2480 = vmatprep.subr.mxu0 %v1057_v58 }
 0xd68   :  { %2440 = vmatmul.mubr.msk.f32.vlgmr.msra.gmra.mxu0 %vm44_vm0, %v1160_v20  ;;  %v1054_v20 = vld [vmem:[%s3211_s1 + $0x1a0] sm:$0xff] }
 0xd69   :  { %2481 = vmatpush3.msra.mxu0 %v1057_v58 }
 0xd6a   :  { %2482 = vmatprep.subr.mxu0 %v1056_v53 }
 0xd6b   :  { %2483 = vmatpush3.msra.mxu0 %v1056_v53 }
 0xd6c   :  { %2484 = vmatprep.subr.mxu0 %v1055_v19 }
 0xd6d   :  { %2485 = vmatpush3.msra.mxu0 %v1055_v19 }
 0xd6e   :  { %2486 = vmatprep.subr.mxu0 %v1054_v20 }
 0xd6f   :  { %2487 = vmatpush3.msra.mxu0 %v1054_v20 }
 0xe28   :  { %v2441_v1 = vpop.f32.mrf.mxu0 }
 0xe29   :  { %v1392_v3 = vadd.f32 %v2441_v1, %v2789_v9  ;;  %v1287_v9 = vmul.f32 %v2416_v43, %v2874_v38  ;;  %v1060_v1 = vld [vmem:[%s3211_s1 + $0x1d0] sm:$0xff] }
 0xe2a   :  { %v1386_v15 = vpop.f32.mrf.mxu0 }
 0xe2b   :  { %v1387_v5 = vadd.f32 %v1386_v15, %v2794_v11  ;;  %v1398_v16 = vsel %vm486_vm2, %v1392_v3, -inf  ;;  %v1288_v11 = vmul.f32 %v1257_v44, %v2881_v41  ;;  %v1058_v15 = vld [vmem:[%s3211_s1 + $0x1c0] sm:$0xff] }
 0xe2c   :  { %1399 = vmax.xlane.f32.xlu0 %v1398_v16 }
 0xe2d   :  { %v1395_v33 = vsel %vm486_vm2, %v1387_v5, -inf }
 0xe2e   :  { %1396 = vmax.xlane.f32.xlu1 %v1395_v33 }
 0xe3f   :  { %1512 = vrot.lane.b32.xlu1 %v1290_v7, %s2576_s29 }
 0xe42   :  { %1514 = vrot.lane.b32.xlu0 %v1291_v31, %s2576_s29 }
 0xe43   :  { %1510 = vrot.lane.b32.xlu1 %v1289_v25, %s2576_s29 }
 0xe46   :  { %1506 = vrot.lane.b32.xlu0 %v1287_v9, %s2576_s29 }
 0xe47   :  { %1508 = vrot.lane.b32.xlu1 %v1288_v11, %s2576_s29  ;;  %v2119_v11 = vld [vmem:[%s3211_s1 + $0x224] ss:$0 sm:$0xff] }
 0xe4a   :  { %1502 = vrot.lane.b32.xlu0 %v1285_v36, %s2576_s29 }
 0xe4b   :  { %1504 = vrot.lane.b32.xlu1 %v1286_v26, %s2576_s29  ;;  %v2120_v26 = vld [vmem:[%s3211_s1 + $0x225] ss:$0 sm:$0xff] }
 0xe4f   :  { %1500 = vrot.lane.b32.xlu1 %v1284_v30, %s2576_s29 }
 0xeb5   :  { %v1400_v39 = vpop.xlane.xlu0 %1399 }
 0xeb6   :  { %v1402_v38 = vsub.f32 %v1392_v3, %v1400_v39  ;;  %v1059_v3 = vld [vmem:[%s3211_s1 + $0x1c8] sm:$0xff] }
 0xeb7   :  { %v1397_v4 = vpop.xlane.xlu1 %1396 }
 0xeb8   :  { %v1401_v41 = vsub.f32 %v1387_v5, %v1397_v4  ;;  %v1405_v49 = vmul.f32 1.442695, %v1402_v38 }
 0xeb9   :  { %v1515_v27 = vpop.permute.xlu0 %1514 }
 0xeba   :  { %v1403_v28 = vmul.f32 1.442695, %v1401_v41  ;;  %2461 = vmatprep.subr.mxu1 %v1515_v27 }
 0xebb   :  { %v1513_v59 = vpop.permute.xlu1 %1512 }
 0xebc   :  { %2556 = vpow2.f32 %v1403_v28  ;;  %v1068_v28 = vld [vmem:[%s3211_s1 + $0x210] sm:$0xff] }
 0xebd   :  { %2558 = vpow2.f32 %v1405_v49  ;;  %v1507_v35 = vpop.permute.xlu0 %1506 }
 0xebf   :  { %v1511_v60 = vpop.permute.xlu1 %1510 }
 0xec1   :  { %v1503_v40 = vpop.permute.xlu0 %1502 }
 0xec3   :  { %v1509_v51 = vpop.permute.xlu1 %1508 }
 0xec7   :  { %v1505_v37 = vpop.permute.xlu1 %1504 }
 0xec9   :  { %v2557_v29 = vpop.eup %2556 }
 0xeca   :  { %v2559_v32 = vpop.eup %2558  ;;  %2458 = vmatprep.mubr.msk.f32.mxu1 %vm486_vm2, %v2557_v29 }
 0xecb   :  { %2459 = vmatmul.mubr.msk.f32.vlgmr.msra.gmra.mxu1 %vm486_vm2, %v2559_v32  ;;  %v1501_v56 = vpop.permute.xlu1 %1500 }
 0xecc   :  { %2462 = vmatpush3.msra.mxu1 %v1515_v27  ;;  %v1069_v27 = vld [vmem:[%s3211_s1 + $0x218] sm:$0xff] }
 0xecd   :  { %2463 = vmatprep.subr.mxu1 %v1513_v59  ;;  %2502 = vmatprep.subr.mxu0 %v1069_v27 }
 0xece   :  { %2464 = vmatpush3.msra.mxu1 %v1513_v59  ;;  %v1067_v59 = vld [vmem:[%s3211_s1 + $0x208] sm:$0xff] }
 0xecf   :  { %2465 = vmatprep.subr.mxu1 %v1511_v60 }
 0xed0   :  { %2466 = vmatpush3.msra.mxu1 %v1511_v60  ;;  %v1066_v60 = vld [vmem:[%s3211_s1 + $0x200] sm:$0xff] }
 0xed1   :  { %2467 = vmatprep.subr.mxu1 %v1509_v51 }
 0xed2   :  { %2468 = vmatpush3.msra.mxu1 %v1509_v51  ;;  %v1063_v51 = vld [vmem:[%s3211_s1 + $0x1e8] sm:$0xff] }
 0xed3   :  { %2469 = vmatprep.subr.mxu1 %v1507_v35 }
 0xed4   :  { %2470 = vmatpush3.msra.mxu1 %v1507_v35  ;;  %v1062_v35 = vld [vmem:[%s3211_s1 + $0x1e0] sm:$0xff] }
 0xed5   :  { %2471 = vmatprep.subr.mxu1 %v1505_v37 }
 0xed6   :  { %2472 = vmatpush3.msra.mxu1 %v1505_v37  ;;  %v2121_v37 = vld [vmem:[%s3211_s1 + $0x222] ss:$0 sm:$0xff] }
 0xed7   :  { %2473 = vmatprep.subr.mxu1 %v1503_v40 }
 0xed8   :  { %2474 = vmatpush3.msra.mxu1 %v1503_v40 }
 0xed9   :  { %2475 = vmatprep.subr.mxu1 %v1501_v56 }
 0xeda   :  { %2476 = vmatpush3.msra.mxu1 %v1501_v56 }
 0xf8b   :  { %v2460_v62 = vpop.f32.mrf.mxu1 }
 0xf8c   :  { %v1485_v0 = vadd.f32 1e-20, %v2460_v62 }
 0xf8d   :  { %v1479_v2 = vpop.f32.mrf.mxu1 }
 0xf8e   :  { %v1480_v54 = vadd.f32 1e-20, %v1479_v2  ;;  %2560 = vrcp.f32 %v1485_v0 }
 0xf90   :  { %2562 = vrcp.f32 %v1480_v54 }
 0xf9b   :  { %v2561_v52 = vpop.eup %2560 }
 0xf9c   :  { %v1491_v18 = vmul.f32 %v2561_v52, %v2559_v32  ;;  %v1064_v32 = vld [vmem:[%s3211_s1 + $0x1f0] sm:$0xff] }
 0xf9d   :  { %v2563_v6 = vpop.eup %2562 }
 0xf9e   :  { %v1490_v50 = vmul.f32 %v2563_v6, %v2557_v29  ;;  %v1065_v29 = vld [vmem:[%s3211_s1 + $0x1f8] sm:$0xff] }
 0xfa0   :  { %2477 = vmatprep.mubr.msk.f32.mxu1 %vm486_vm2, %v1490_v50 }
 0xfa1   :  { %2478 = vmatmul.mubr.msk.f32.vlgmr.msra.gmra.mxu1 %vm486_vm2, %v1491_v18 }
0x1061   :  { %v2479_v21 = vpop.f32.mrf.mxu1 }
0x1063   :  { %v1596_v10 = vpop.f32.mrf.mxu1 }
0x1064   :  { %2488 = vmatprep.mubr.msk.f32.mxu0 %vm44_vm0, %v1596_v10 }
0x1065   :  { %2489 = vmatmul.mubr.msk.f32.vlgmr.msra.gmra.mxu0 %vm44_vm0, %v2479_v21 }
0x1066   :  { %2503 = vmatpush3.msra.mxu0 %v1069_v27 }
0x1067   :  { %2504 = vmatprep.subr.mxu0 %v1068_v28 }
0x1068   :  { %2505 = vmatpush3.msra.mxu0 %v1068_v28 }
0x1069   :  { %2506 = vmatprep.subr.mxu0 %v1067_v59 }
0x106a   :  { %2507 = vmatpush3.msra.mxu0 %v1067_v59 }
0x106b   :  { %2508 = vmatprep.subr.mxu0 %v1066_v60 }
0x106c   :  { %2509 = vmatpush3.msra.mxu0 %v1066_v60  ;;  %v39_v60 = vld [vmem:[%s3211_s1 + $0xc0] sm:$0x3] }
0x106d   :  { %2510 = vmatprep.subr.mxu0 %v1065_v29 }
0x106e   :  { %2511 = vmatpush3.msra.mxu0 %v1065_v29  ;;  %v2130_v29 = vld [vmem:[%s3211_s1 + $0xd0] ss:$0 sm:$0xff] }
0x106f   :  { %2512 = vmatprep.subr.mxu0 %v1064_v32 }
0x1070   :  { %2513 = vmatpush3.msra.mxu0 %v1064_v32 }
0x1071   :  { %2514 = vmatprep.subr.mxu0 %v1063_v51 }
0x1072   :  { %2515 = vmatpush3.msra.mxu0 %v1063_v51 }
0x1073   :  { %2516 = vmatprep.subr.mxu0 %v1062_v35 }
0x1074   :  { %2517 = vmatpush3.msra.mxu0 %v1062_v35 }
0x1125   :  { %v2490_v12 = vpop.f32.mrf.mxu0 }
0x1126   :  { %v1687_v34 = vadd.f32 %v2490_v12, %v2116_v22 }
0x1127   :  { %v1681_v42 = vpop.f32.mrf.mxu0 }
0x1128   :  { %v1682_v43 = vadd.f32 %v2116_v22, %v1681_v42  ;;  %v1691_v23 = vadd.f32 %v1687_v34, %v3031_v17 }
0x112a   :  { %v1695_v13 = vsel %vm44_vm0, %v1691_v23, 0.0  ;;  %v1690_v44 = vadd.f32 %v1682_v43, %v3029_v8  ;;  %v1061_v8 = vld [vmem:[%s3211_s1 + $0x1d8] sm:$0xff] }
0x112b   :  { %1696 = vadd.xlane.f32.xlu1 %v1695_v13  ;;  %2491 = vmatprep.subr.mxu1 %v1061_v8  ;;  %v2124_v13 = vld [vmem:[%s3211_s1 + $0x223] ss:$0 sm:$0xff] }
0x112c   :  { %v1692_v24 = vsel %vm44_vm0, %v1690_v44, 0.0  ;;  %2492 = vmatpush3.msra.mxu1 %v1061_v8 }
0x112d   :  { %1693 = vadd.xlane.f32.xlu0 %v1692_v24  ;;  %2493 = vmatprep.subr.mxu1 %v1060_v1 }
0x112e   :  { %2494 = vmatpush3.msra.mxu1 %v1060_v1 }
0x112f   :  { %2495 = vmatprep.subr.mxu1 %v1059_v3 }
0x1130   :  { %2496 = vmatpush3.msra.mxu1 %v1059_v3 }
0x1131   :  { %2497 = vmatprep.subr.mxu1 %v1058_v15 }
0x1132   :  { %2498 = vmatpush3.msra.mxu1 %v1058_v15 }
0x11b4   :  { %v1697_v45 = vpop.xlane.xlu1 %1696 }
0x11b5   :  { %v1699_v14 = vmul.f32 0.03125, %v1697_v45 }
0x11b6   :  { %v1694_v46 = vpop.xlane.xlu0 %1693 }
0x11b7   :  { %v1698_v47 = vmul.f32 0.03125, %v1694_v46  ;;  %v1701_v48 = vsub.f32 %v1691_v23, %v1699_v14 }
0x11b9   :  { %v1700_v55 = vsub.f32 %v1690_v44, %v1698_v47  ;;  %v1703_v63 = vmul.f32 %v1701_v48, %v1701_v48 }
0x11bb   :  { %v1702_v57 = vmul.f32 %v1700_v55, %v1700_v55  ;;  %v1707_v17 = vsel %vm44_vm0, %v1703_v63, 0.0 }
0x11bd   :  { %v1704_v61 = vsel %vm44_vm0, %v1702_v57, 0.0 }
0x11be   :  { %1705 = vadd.xlane.f32.xlu0 %v1704_v61 }
0x11c2   :  { %1708 = vadd.xlane.f32.xlu0 %v1707_v17 }
0x1247   :  { %v1706_v5 = vpop.xlane.xlu0 %1705 }
0x1248   :  { %v1710_v16 = vmul.f32 0.03125, %v1706_v5 }
0x124a   :  { %v1712_v33 = vadd.f32 1e-12, %v1710_v16 }
0x124b   :  { %v1709_v7 = vpop.xlane.xlu0 %1708 }
0x124c   :  { %2564 = vrsqrt.f32 %v1712_v33  ;;  %v1711_v31 = vmul.f32 0.03125, %v1709_v7  ;;  %v2578_v33 = vmov 0.0  }
0x124d   :  { %2521 = vmatprep.subr.mxu1 %v2578_v33 }
0x124e   :  { %v1713_v25 = vadd.f32 1e-12, %v1711_v31 }
0x1250   :  { %2566 = vrsqrt.f32 %v1713_v25 }
0x1259   :  { %v2565_v9 = vpop.eup %2564 }
0x125a   :  { %v1716_v36 = vmul.f32 %v2565_v9, %v1700_v55 }
0x125c   :  { %v1722_v30 = vmul.f32 %v2119_v11, %v1716_v36 }
0x125d   :  { %v2567_v39 = vpop.eup %2566 }
0x125e   :  { %v1717_v38 = vmul.f32 %v2567_v39, %v1701_v48  ;;  %v3149_v4 = vadd.f32 %v2120_v26, %v1722_v30  ;;  %v2127_v30 = vld [vmem:[%s3211_s1 + $0x226] ss:$0 sm:$0xff] }
0x1260   :  { %v1723_v41 = vmul.f32 %v2119_v11, %v1717_v38  ;;  %2499 = vmatprep.mubr.msk.f32.mxu1 %vm44_vm0, %v3149_v4 }
0x1262   :  { %v1729_v49 = vadd.f32 %v2120_v26, %v1723_v41 }
0x1264   :  { %2500 = vmatmul.mubr.msk.f32.vlgmr.msra.gmra.mxu1 %vm44_vm0, %v1729_v49 }
0x1265   :  { %2525 = vmatprep.mubr.msk.f32.mxu1 %vm2579_vm3, %v2578_v33 }
0x1324   :  { %v2501_v40 = vpop.f32.mrf.mxu1 }
0x1325   :  { %v1812_v56 = vadd.f32 %v2501_v40, %v2121_v37  ;;  %v2131_v40 = vld [vmem:[%s3211_s1 + $0xd1] ss:$0 sm:$0xff] }
0x1326   :  { %v1806_v58 = vpop.f32.mrf.mxu1 }
0x1327   :  { %v1816_v53 = vmul.f32 %v1812_v56, %v1812_v56  ;;  %v1807_v62 = vadd.f32 %v2121_v37, %v1806_v58 }
0x1329   :  { %v1818_v0 = vmul.f32 %v1816_v53, %v1812_v56  ;;  %v1815_v2 = vmul.f32 %v1807_v62, %v1807_v62 }
0x132b   :  { %v1820_v54 = vmul.f32 0.044715, %v1818_v0  ;;  %v1817_v52 = vmul.f32 %v1815_v2, %v1807_v62 }
0x132d   :  { %v1822_v6 = vadd.f32 %v1820_v54, %v1812_v56  ;;  %v1819_v50 = vmul.f32 0.044715, %v1817_v52 }
0x132f   :  { %v1824_v18 = vmul.f32 0.7978846, %v1822_v6  ;;  %v1821_v19 = vadd.f32 %v1819_v50, %v1807_v62 }
0x1331   :  { %2568 = vtanh.f32 %v1824_v18  ;;  %v1823_v20 = vmul.f32 0.7978846, %v1821_v19 }
0x1333   :  { %2570 = vtanh.f32 %v1823_v20 }
0x133e   :  { %v2569_v21 = vpop.eup %2568 }
0x133f   :  { %v1828_v10 = vadd.f32 1.0, %v2569_v21 }
0x1340   :  { %v2571_v22 = vpop.eup %2570 }
0x1341   :  { %v1827_v12 = vadd.f32 1.0, %v2571_v22  ;;  %v1830_v34 = vmul.f32 0.5, %v1828_v10 }
0x1343   :  { %v1829_v42 = vmul.f32 0.5, %v1827_v12  ;;  %v1832_v23 = vmul.f32 %v1830_v34, %v1812_v56 }
0x1345   :  { %v1831_v43 = vmul.f32 %v1829_v42, %v1807_v62 }
0x1347   :  { %2518 = vmatprep.mubr.msk.f32.mxu0 %vm486_vm2, %v1831_v43 }
0x1348   :  { %2519 = vmatmul.mubr.msk.f32.vlgmr.msra.gmra.mxu0 %vm486_vm2, %v1832_v23 }
0x1408   :  { %v2520_v44 = vpop.f32.mrf.mxu0 }
0x1409   :  { %v1915_v24 = vadd.f32 %v2520_v44, %v2124_v13 }
0x140a   :  { %v1909_v45 = vpop.f32.mrf.mxu0 }
0x140b   :  { %v1910_v14 = vadd.f32 %v2124_v13, %v1909_v45  ;;  %v1919_v46 = vadd.f32 %v1915_v24, %v1729_v49 }
0x140d   :  { %v1923_v47 = vsel %vm44_vm0, %v1919_v46, 0.0  ;;  %v1918_v48 = vadd.f32 %v1910_v14, %v3149_v4  ;;  %v2128_v4 = vld [vmem:[%s3211_s1 + $0x227] ss:$0 sm:$0xff] }
0x140e   :  { %1924 = vadd.xlane.f32.xlu0 %v1923_v47 }
0x140f   :  { %v1920_v55 = vsel %vm44_vm0, %v1918_v48, 0.0 }
0x1410   :  { %1921 = vadd.xlane.f32.xlu1 %v1920_v55 }
0x1497   :  { %v1925_v57 = vpop.xlane.xlu0 %1924 }
0x1498   :  { %v1927_v61 = vmul.f32 0.03125, %v1925_v57 }
0x1499   :  { %v1922_v63 = vpop.xlane.xlu1 %1921 }
0x149a   :  { %v1929_v17 = vsub.f32 %v1919_v46, %v1927_v61  ;;  %v1926_v8 = vmul.f32 0.03125, %v1922_v63 }
0x149c   :  { %v1928_v1 = vsub.f32 %v1918_v48, %v1926_v8  ;;  %v1931_v3 = vmul.f32 %v1929_v17, %v1929_v17 }
0x149e   :  { %v1935_v15 = vsel %vm44_vm0, %v1931_v3, 0.0  ;;  %v1930_v5 = vmul.f32 %v1928_v1, %v1928_v1 }
0x149f   :  { %1936 = vadd.xlane.f32.xlu0 %v1935_v15 }
0x14a0   :  { %v1932_v16 = vsel %vm44_vm0, %v1930_v5, 0.0 }
0x14a1   :  { %1933 = vadd.xlane.f32.xlu1 %v1932_v16 }
0x1528   :  { %v1937_v7 = vpop.xlane.xlu0 %1936 }
0x1529   :  { %v1939_v31 = vmul.f32 0.03125, %v1937_v7 }
0x152a   :  { %v1934_v25 = vpop.xlane.xlu1 %1933 }
0x152b   :  { %v1941_v9 = vadd.f32 1e-12, %v1939_v31  ;;  %v1938_v11 = vmul.f32 0.03125, %v1934_v25 }
0x152d   :  { %2572 = vrsqrt.f32 %v1941_v9  ;;  %v1940_v36 = vadd.f32 1e-12, %v1938_v11 }
0x152f   :  { %2574 = vrsqrt.f32 %v1940_v36 }
0x153a   :  { %v2573_v26 = vpop.eup %2572 }
0x153b   :  { %v1945_v39 = vmul.f32 %v2573_v26, %v1929_v17 }
0x153c   :  { %v2575_v38 = vpop.eup %2574 }
0x153d   :  { %v1951_v41 = vmul.f32 %v2127_v30, %v1945_v39  ;;  %v1944_v49 = vmul.f32 %v2575_v38, %v1928_v1 }
0x153f   :  { %v1957_v27 = vadd.f32 %v2128_v4, %v1951_v41  ;;  %v1950_v28 = vmul.f32 %v2127_v30, %v1944_v49 }
0x1541   :  { %2522 = vmatpush3.msra.mxu1 %v1957_v27  ;;  %v1956_v59 = vadd.f32 %v2128_v4, %v1950_v28 }
0x1542   :  { %2523 = vmatprep.subr.mxu1 %v2578_v33 }
0x1543   :  { %2524 = vmatpush3.msra.mxu1 %v1956_v59 }
0x1544   :  { %2526 = vmatmul.mubr.msk.f32.vlgmr.msra.gmra.mxu1 %vm205_vm1, %v39_v60 }
0x1604   :  { %v2027_v32 = vpop.f32.mrf.mxu1 }
0x1605   :  { %v2035_v51 = vmul.f32 %v2130_v29, %v2027_v32 }
0x1606   :  { %v2527_v35 = vpop.f32.mrf.mxu1 }
0x1607   :  { %v2037_v37 = vsel %vm2036_vm4, %v2035_v51, 0.0 }
0x1608   :  { %2038 = vadd.xlane.f32.xlu0 %v2037_v37 }
0x1691   :  { %v2039_v56 = vpop.xlane.xlu0 %2038 }
0x1692   :  { %v2044_v58 = vadd.f32 %v2131_v40, %v2039_v56 }
0x1694   :  { %2046 = vst.msk [vmem:[%s3212_s2] sm:$0x3] %vm2045_vm5, %v2044_v58 }

</bundles_post_ra>
